<compile_context>
chip_gen: v6e
topology: v6e:2x2x1
jax: 0.10.0
libtpu: 0.0.40
codegen_flags: <defaults>
</compile_context>

<pallas_src>
import functools

import jax
import jax.numpy as jnp
from jax.experimental import pallas as pl
from jax.experimental.pallas import tpu as pltpu


def gcn_fused_kernel(a_ref, x_ref, w1_ref, b1_ref, w2_ref, b2_ref, o_ref,
                     *, prop_step, residual, relu):
    """Fused prop_step-layer GCN on a fully VMEM-resident graph.

    a_ref : (N, N)       raw 0/1 adjacency, bf16 (exact), streamed once from HBM
    x_ref : (N, F_in)    input node features, f32
    w*_ref: (F, F_out)   GraphConv weights, f32
    b*_ref: (1, F_out)   GraphConv biases, f32
    o_ref : (N, F_out)   lane-dense output
    """
    # Upcast the bf16 adjacency in VMEM (0/1 entries -> exact) for f32 MXU math.
    a = a_ref[...].astype(jnp.float32)

    # Fold symmetric normalization D^-1/2 A D^-1/2 into the kernel: degree row
    # reduction (XLU) + rsqrt (EUP) on the resident A — no extra O(N^2) HBM pass.
    deg = jnp.sum(a, axis=1, keepdims=True)                    # (N, 1)
    d_inv_sqrt = jnp.where(deg > 0, jax.lax.rsqrt(deg), 0.0)   # (N, 1)

    x = x_ref[...]
    h = x
    for step in range(prop_step):
        w_ref = w1_ref if step == 0 else w2_ref
        b_ref = b1_ref if step == 0 else b2_ref
        if step > 0 and relu:          # _apply_norm_and_activation (relu only)
            h = jnp.maximum(h, 0.0)
        # TODO(synk): norm=True (LayerNorm+Dropout) and linear=True (MLP) branches
        # are off in the default config and not implemented here.
        # GraphConv norm='both', project-first:  D^-1/2 A D^-1/2 (H W) + b
        hw = jnp.dot(h, w_ref[...], preferred_element_type=jnp.float32)
        hw = d_inv_sqrt * hw
        h = jnp.dot(a, hw, preferred_element_type=jnp.float32)
        h = d_inv_sqrt * h + b_ref[...]
        if residual:                   # trace-time guard: residual defaults to 0
            h = h + residual * x
    o_ref[...] = h.astype(o_ref.dtype)


def gcn_forward(adj, x, w1, b1, w2, b2, *, prop_step=2, residual=0.0, relu=False):
    """GCN.forward with default flags (drop_edge / norm / linear off).

    TODO(synk): drop_edge (random DGL edge removal + add_self_loop) has no clean
    Pallas equivalent and is disabled by default; the graph is densified host-side.
    """
    n = adj.shape[0]
    f_in = x.shape[1]
    f_out = w1.shape[1]
    # bf16 adjacency: 0/1 entries are exact, HBM traffic for the dominant array
    # is halved, and it stays portable to v7x (no integer MXU path there).
    adj_bf16 = adj.astype(jnp.bfloat16)

    kernel = functools.partial(gcn_fused_kernel, prop_step=prop_step,
                               residual=residual, relu=relu)
    return pl.pallas_call(
        kernel,
        out_shape=jax.ShapeDtypeStruct((n, f_out), jnp.float32),
        grid=(1,),  # whole problem fits in VMEM -> one fused step, no HBM round-trip
        in_specs=[
            pl.BlockSpec((n, n), lambda i: (0, 0)),
            pl.BlockSpec((n, f_in), lambda i: (0, 0)),
            pl.BlockSpec((f_in, f_out), lambda i: (0, 0)),
            pl.BlockSpec((1, f_out), lambda i: (0, 0)),
            pl.BlockSpec((f_out, f_out), lambda i: (0, 0)),
            pl.BlockSpec((1, f_out), lambda i: (0, 0)),
        ],
        # Lane-dense output: f_out (h_feats) sits on the 128-lane axis.
        out_specs=pl.BlockSpec((n, f_out), lambda i: (0, 0)),
        compiler_params=pltpu.CompilerParams(
            dimension_semantics=("arbitrary",),
        ),
    )(adj_bf16, x, w1, b1, w2, b2)


if __name__ == "__main__":
    key = jax.random.PRNGKey(0)
    N = 256          # number of nodes
    IN_FEATS = 128   # == H_FEATS so the (disabled) residual path is shape-consistent
    H_FEATS = 128

    k_x, k_e1, k_e2, k_w1, k_b1, k_w2, k_b2 = jax.random.split(key, 7)

    # Synthetic undirected graph: ring (no isolated nodes) + random extra edges,
    # no self-loops (drop_edge / add_self_loop disabled by default flags).
    idx = jnp.arange(N)
    adj = jnp.zeros((N, N), jnp.float32)
    adj = adj.at[idx, (idx + 1) % N].set(1.0)
    adj = adj.at[(idx + 1) % N, idx].set(1.0)
    src = jax.random.randint(k_e1, (512,), 0, N)
    dst = jax.random.randint(k_e2, (512,), 0, N)
    adj = adj.at[src, dst].set(1.0)
    adj = adj.at[dst, src].set(1.0)
    adj = adj.at[idx, idx].set(0.0)

    x = jax.random.normal(k_x, (N, IN_FEATS), dtype=jnp.float32)

    # Linear-style init for the two GraphConv weights / biases.
    w1 = jax.random.uniform(k_w1, (IN_FEATS, H_FEATS), jnp.float32, -1.0, 1.0) / jnp.sqrt(
        jnp.float32(IN_FEATS))
    b1 = jax.random.uniform(k_b1, (1, H_FEATS), jnp.float32, -1.0, 1.0) / jnp.sqrt(
        jnp.float32(IN_FEATS))
    w2 = jax.random.uniform(k_w2, (H_FEATS, H_FEATS), jnp.float32, -1.0, 1.0) / jnp.sqrt(
        jnp.float32(H_FEATS))
    b2 = jax.random.uniform(k_b2, (1, H_FEATS), jnp.float32, -1.0, 1.0) / jnp.sqrt(
        jnp.float32(H_FEATS))

    out = gcn_forward(adj, x, w1, b1, w2, b2)
    jax.block_until_ready(out)

    # Pure-JAX reference: two GraphConv layers with symmetric normalization.
    deg = jnp.sum(adj, axis=1)
    d_inv_sqrt = jnp.where(deg > 0, jax.lax.rsqrt(deg), 0.0)
    a_norm = adj * d_inv_sqrt[:, None] * d_inv_sqrt[None, :]
    ref = a_norm @ (x @ w1) + b1
    ref = a_norm @ (ref @ w2) + b2

    assert out.shape == (N, H_FEATS)
    max_err = float(jnp.max(jnp.abs(out - ref)))
    assert jnp.allclose(out, ref, atol=1e-2, rtol=1e-2), max_err

    print("KERNEL_OK")
</pallas_src>

<mosaic_0001>
module attributes {stable_mosaic.version = 11 : i64} {
  func.func @gcn_fused_kernel(%arg0: i32, %arg1: memref<256x256xbf16, #tpu.memory_space<vmem>>, %arg2: memref<256x128xf32, #tpu.memory_space<vmem>>, %arg3: memref<128x128xf32, #tpu.memory_space<vmem>>, %arg4: memref<1x128xf32, #tpu.memory_space<vmem>>, %arg5: memref<128x128xf32, #tpu.memory_space<vmem>>, %arg6: memref<1x128xf32, #tpu.memory_space<vmem>>, %arg7: memref<256x128xf32, #tpu.memory_space<vmem>>) attributes {dimension_semantics = [#tpu.dimension_semantics<arbitrary>], iteration_bounds = array<i64: 1>, scalar_prefetch = 0 : i64, scratch_operands = 0 : i64, tpu.core_type = #tpu.core_type<tc>, window_params = [{pipeline_mode = #tpu.pipeline_mode<synchronous>, transform_indices = @transform_0, window_bounds = array<i64: 256, 256>}, {pipeline_mode = #tpu.pipeline_mode<synchronous>, transform_indices = @transform_1, window_bounds = array<i64: 256, 128>}, {pipeline_mode = #tpu.pipeline_mode<synchronous>, transform_indices = @transform_2, window_bounds = array<i64: 128, 128>}, {pipeline_mode = #tpu.pipeline_mode<synchronous>, transform_indices = @transform_3, window_bounds = array<i64: 1, 128>}, {pipeline_mode = #tpu.pipeline_mode<synchronous>, transform_indices = @transform_4, window_bounds = array<i64: 128, 128>}, {pipeline_mode = #tpu.pipeline_mode<synchronous>, transform_indices = @transform_5, window_bounds = array<i64: 1, 128>}, {pipeline_mode = #tpu.pipeline_mode<synchronous>, transform_indices = @transform_6, window_bounds = array<i64: 256, 128>}]} {
    %c0 = arith.constant 0 : index
    %c0_0 = arith.constant 0 : index
    %0 = vector.load %arg1[%c0, %c0_0] : memref<256x256xbf16, #tpu.memory_space<vmem>>, vector<256x256xbf16>
    %1 = arith.extf %0 : vector<256x256xbf16> to vector<256x256xf32>
    %cst = arith.constant dense<0.000000e+00> : vector<256xf32>
    %2 = vector.multi_reduction <add>, %1, %cst [1] : vector<256x256xf32> to vector<256xf32>
    %3 = vector.shape_cast %2 : vector<256xf32> to vector<256x1xf32>
    %cst_1 = arith.constant 0.000000e+00 : f32
    %4 = vector.broadcast %cst_1 : f32 to vector<256x1xf32>
    %5 = arith.cmpf ogt, %3, %4 : vector<256x1xf32>
    %6 = math.rsqrt %3 : vector<256x1xf32>
    %cst_2 = arith.constant 0.000000e+00 : f32
    %7 = vector.broadcast %cst_2 : f32 to vector<256x1xf32>
    %8 = arith.select %5, %6, %7 : vector<256x1xi1>, vector<256x1xf32>
    %c0_3 = arith.constant 0 : index
    %c0_4 = arith.constant 0 : index
    %9 = vector.load %arg2[%c0_3, %c0_4] : memref<256x128xf32, #tpu.memory_space<vmem>>, vector<256x128xf32>
    %c0_5 = arith.constant 0 : index
    %c0_6 = arith.constant 0 : index
    %10 = vector.load %arg3[%c0_5, %c0_6] : memref<128x128xf32, #tpu.memory_space<vmem>>, vector<128x128xf32>
    %cst_7 = arith.constant dense<0.000000e+00> : vector<256x128xf32>
    %11 = tpu.matmul %9, %10, %cst_7 {dimension_numbers = #tpu.dot_dimension_numbers<[1], [0], [0], [1], [0, 0, 1, 1], [], []>} : vector<256x128xf32>, vector<128x128xf32>, vector<256x128xf32> -> vector<256x128xf32>
    %12 = vector.broadcast %8 : vector<256x1xf32> to vector<256x128xf32>
    %13 = arith.mulf %12, %11 : vector<256x128xf32>
    %cst_8 = arith.constant dense<0.000000e+00> : vector<256x128xf32>
    %14 = tpu.matmul %1, %13, %cst_8 {dimension_numbers = #tpu.dot_dimension_numbers<[1], [0], [0], [1], [0, 0, 1, 1], [], []>} : vector<256x256xf32>, vector<256x128xf32>, vector<256x128xf32> -> vector<256x128xf32>
    %15 = vector.broadcast %8 : vector<256x1xf32> to vector<256x128xf32>
    %16 = arith.mulf %15, %14 : vector<256x128xf32>
    %c0_9 = arith.constant 0 : index
    %c0_10 = arith.constant 0 : index
    %17 = vector.load %arg4[%c0_9, %c0_10] : memref<1x128xf32, #tpu.memory_space<vmem>>, vector<1x128xf32>
    %18 = vector.broadcast %17 : vector<1x128xf32> to vector<256x128xf32>
    %19 = arith.addf %16, %18 : vector<256x128xf32>
    %c0_11 = arith.constant 0 : index
    %c0_12 = arith.constant 0 : index
    %20 = vector.load %arg5[%c0_11, %c0_12] : memref<128x128xf32, #tpu.memory_space<vmem>>, vector<128x128xf32>
    %cst_13 = arith.constant dense<0.000000e+00> : vector<256x128xf32>
    %21 = tpu.matmul %19, %20, %cst_13 {dimension_numbers = #tpu.dot_dimension_numbers<[1], [0], [0], [1], [0, 0, 1, 1], [], []>} : vector<256x128xf32>, vector<128x128xf32>, vector<256x128xf32> -> vector<256x128xf32>
    %22 = vector.broadcast %8 : vector<256x1xf32> to vector<256x128xf32>
    %23 = arith.mulf %22, %21 : vector<256x128xf32>
    %cst_14 = arith.constant dense<0.000000e+00> : vector<256x128xf32>
    %24 = tpu.matmul %1, %23, %cst_14 {dimension_numbers = #tpu.dot_dimension_numbers<[1], [0], [0], [1], [0, 0, 1, 1], [], []>} : vector<256x256xf32>, vector<256x128xf32>, vector<256x128xf32> -> vector<256x128xf32>
    %25 = vector.broadcast %8 : vector<256x1xf32> to vector<256x128xf32>
    %26 = arith.mulf %25, %24 : vector<256x128xf32>
    %c0_15 = arith.constant 0 : index
    %c0_16 = arith.constant 0 : index
    %27 = vector.load %arg6[%c0_15, %c0_16] : memref<1x128xf32, #tpu.memory_space<vmem>>, vector<1x128xf32>
    %28 = vector.broadcast %27 : vector<1x128xf32> to vector<256x128xf32>
    %29 = arith.addf %26, %28 : vector<256x128xf32>
    %c0_17 = arith.constant 0 : index
    %c0_18 = arith.constant 0 : index
    %30 = vector.load %arg7[%c0_17, %c0_18] : memref<256x128xf32, #tpu.memory_space<vmem>>, vector<256x128xf32>
    tpu.vector_store %arg7[%c0_17, %c0_18], %29 {strides = array<i32>} : memref<256x128xf32, #tpu.memory_space<vmem>>, vector<256x128xf32>,
    return
  }
  func.func @transform_0(%arg0: i32) -> (i32, i32) {
    %c0_i32 = arith.constant 0 : i32
    %c0_i32_0 = arith.constant 0 : i32
    %c0_i32_1 = arith.constant 0 : i32
    return %c0_i32, %c0_i32_0 : i32, i32
  }
  func.func @transform_1(%arg0: i32) -> (i32, i32) {
    %c0_i32 = arith.constant 0 : i32
    %c0_i32_0 = arith.constant 0 : i32
    %c0_i32_1 = arith.constant 0 : i32
    return %c0_i32, %c0_i32_0 : i32, i32
  }
  func.func @transform_2(%arg0: i32) -> (i32, i32) {
    %c0_i32 = arith.constant 0 : i32
    %c0_i32_0 = arith.constant 0 : i32
    %c0_i32_1 = arith.constant 0 : i32
    return %c0_i32, %c0_i32_0 : i32, i32
  }
  func.func @transform_3(%arg0: i32) -> (i32, i32) {
    %c0_i32 = arith.constant 0 : i32
    %c0_i32_0 = arith.constant 0 : i32
    %c0_i32_1 = arith.constant 0 : i32
    return %c0_i32, %c0_i32_0 : i32, i32
  }
  func.func @transform_4(%arg0: i32) -> (i32, i32) {
    %c0_i32 = arith.constant 0 : i32
    %c0_i32_0 = arith.constant 0 : i32
    %c0_i32_1 = arith.constant 0 : i32
    return %c0_i32, %c0_i32_0 : i32, i32
  }
  func.func @transform_5(%arg0: i32) -> (i32, i32) {
    %c0_i32 = arith.constant 0 : i32
    %c0_i32_0 = arith.constant 0 : i32
    %c0_i32_1 = arith.constant 0 : i32
    return %c0_i32, %c0_i32_0 : i32, i32
  }
  func.func @transform_6(%arg0: i32) -> (i32, i32) {
    %c0_i32 = arith.constant 0 : i32
    %c0_i32_0 = arith.constant 0 : i32
    %c0_i32_1 = arith.constant 0 : i32
    return %c0_i32, %c0_i32_0 : i32, i32
  }
}

</mosaic_0001>

<bundles_post_ra>
// kernel: tpu_custom_call.1
= control target key start
LH: loop header
LB: loop body
LE: loop exit
PB: predicated region body
PF: predicated region fallthrough
CT: control target
= control target key end

     0   :  { %11 = vsyncpa [#allocation3], 0  ;;  %s2929_s0 = inlined_call_operand.hbm [shape: bf16[256,256], index: 0, kind: input, shape index: {}]   ;;  %s2930_s1 = inlined_call_operand.hbm [shape: f32[256,128], index: 1, kind: input, shape index: {}]   ;;  %s2931_s2 = inlined_call_operand.hbm [shape: f32[128,128], index: 2, kind: input, shape index: {}]   ;;  %s2932_s3 = inlined_call_operand.vmem [shape: f32[1,128], index: 3, kind: input, shape index: {}]   ;;  %s2933_s4 = inlined_call_operand.hbm [shape: f32[128,128], index: 4, kind: input, shape index: {}]   ;;  %s2934_s5 = inlined_call_operand.vmem [shape: f32[1,128], index: 5, kind: input, shape index: {}]   ;;  %s2935_s6 = inlined_call_operand.hbm [shape: f32[256,128], index: 6, kind: output, shape index: {}]  }
   0x1   :  { %12 = vsyncpa [#allocation6], 0 }
   0x2   :  { %13 = vsyncpa [#allocation9], 0 }
   0x3   :  { %14 = vsyncpa [#allocation4], 0  ;;  %s2026_s21 = smov [#allocation5]   ;;  %s2027_s23 = smov [#allocation2]  }
   0x4   :  { %s32_s22 = sshll.u32 %s2026_s21, 4  ;;  %s20_s24 = sshll.u32 %s2027_s23, 4  ;;  %s33_s22 = int_to_ptr.vmem [resolvable:$true] %s32_s22  ;;  %s21_s24 = int_to_ptr.vmem [resolvable:$true] %s20_s24 }
   0x5   :  { %s1926_s25 = scalar_lea.vmem %s33_s22, 4096  ;;  %p1931_p1 = scmp.lt.s32.totalorder %s33_s22, %s33_s22 }
   0x6   :  { %p1927_p0 = scmp.ne.s32.totalorder %s33_s22, %s1926_s25  ;;  %p1932_p2 = scmp.lt.s32.totalorder %s1926_s25, %s1926_s25 }
   0x8   :  { %p1933_p3 = por %p1932_p2, %p1931_p1 }
   0xa   :  { %p1934_p4 = pnand %p1933_p3, %p1927_p0 }
   0xc   :  { %1937 = shalt.err (!%p1934_p4)
}
   0xd   :  { %s2028_s26 = smov 128   ;;  %s2029_s27 = smov 8  }
   0xe   :  { %38 = dma.hbm_to_vmem [thread:$0]  %s2930_s1, 4096, %s33_s22, [#allocation6], %s2028_s26, %s2028_s26, %s2029_s27  }
   0xf   :  { %s1946_s30 = scalar_lea.vmem %s21_s24, 4096  ;;  %p1951_p6 = scmp.lt.s32.totalorder %s21_s24, %s21_s24 }
  0x10   :  { %p1947_p5 = scmp.ne.s32.totalorder %s21_s24, %s1946_s30  ;;  %p1952_p7 = scmp.lt.s32.totalorder %s1946_s30, %s1946_s30 }
  0x12   :  { %p1953_p8 = por %p1952_p7, %p1951_p6 }
  0x14   :  { %p1954_p9 = pnand %p1953_p8, %p1947_p5 }
  0x16   :  { %1957 = shalt.err (!%p1954_p9)
}
  0x17   :  { %26 = dma.hbm_to_vmem [thread:$0]  %s2929_s0, 4096, %s21_s24, [#allocation3], %s2028_s26, %s2028_s26, %s2029_s27  }
  0x18   :  { %s2030_s9 = smov [#allocation7]   ;;  %s2031_s11 = smov [#allocation8]  }
  0x19   :  { %s44_s10 = sshll.u32 %s2030_s9, 4  ;;  %s58_s12 = sshll.u32 %s2031_s11, 4  ;;  %s45_s10 = int_to_ptr.vmem [resolvable:$true] %s44_s10  ;;  %s59_s12 = int_to_ptr.vmem [resolvable:$true] %s58_s12 }
  0x1a   :  { %s1966_s1 = scalar_lea.vmem %s45_s10, 2048  ;;  %p1971_p11 = scmp.lt.s32.totalorder %s45_s10, %s45_s10 }
  0x1b   :  { %p1967_p10 = scmp.ne.s32.totalorder %s45_s10, %s1966_s1  ;;  %p1972_p12 = scmp.lt.s32.totalorder %s1966_s1, %s1966_s1 }
  0x1d   :  { %p1973_p13 = por %p1972_p12, %p1971_p11 }
  0x1f   :  { %p1974_p0 = pnand %p1973_p13, %p1967_p10 }
  0x21   :  { %1977 = shalt.err (!%p1974_p0)
}
  0x22   :  { %50 = dma.hbm_to_vmem [thread:$0]  %s2931_s2, 2048, %s45_s10, [#allocation6], %s2028_s26, %s2028_s26, %s2029_s27  }
  0x23   :  { %s1986_s0 = scalar_lea.vmem %s59_s12, 2048  ;;  %p1991_p2 = scmp.lt.s32.totalorder %s59_s12, %s59_s12 }
  0x24   :  { %p1987_p1 = scmp.ne.s32.totalorder %s59_s12, %s1986_s0  ;;  %p1992_p3 = scmp.lt.s32.totalorder %s1986_s0, %s1986_s0 }
  0x26   :  { %p1993_p4 = por %p1992_p3, %p1991_p2 }
  0x28   :  { %p1994_p5 = pnand %p1993_p4, %p1987_p1 }
  0x2a   :  { %1997 = shalt.err (!%p1994_p5)
}
  0x2b   :  { %64 = dma.hbm_to_vmem [thread:$0]  %s2933_s4, 2048, %s59_s12, [#allocation9], %s2028_s26, %s2028_s26, %s2029_s27  }
  0x2c   :  { %2018 = dma.done.wait [#allocation3], 4096  }
  0x2d   :  { %2019 = vsyncadd [#allocation3], 4294963200 }
  0x2e   :  { %2020 = dma.done.wait [#allocation6], 6144  }
  0x2f   :  { %2021 = vsyncadd [#allocation6], 4294961152 }
  0x30   :  { %2022 = dma.done.wait [#allocation9], 2048  }
  0x31   :  { %2023 = vsyncadd [#allocation9], 4294965248  ;;  %v414_v0 = vld [vmem:[#allocation7 + $0x78] sm:$0xff]  ;;  %v413_v1 = vld [vmem:[#allocation7 + $0x70] sm:$0xff] }
  0x32   :  { %1686 = vmatprep.subr.mxu1 %v414_v0  ;;  %v412_v2 = vld [vmem:[#allocation7 + $0x68] sm:$0xff]  ;;  %v411_v3 = vld [vmem:[#allocation7 + $0x60] sm:$0xff]  ;;  %v410_v5 = vld [vmem:[#allocation7 + $0x58] sm:$0xff] }
  0x33   :  { %1687 = vmatpush3.msra.mxu1 %v414_v0  ;;  %v367_v4 = vld [vmem:[#allocation5] sm:$0xff]  ;;  %v409_v6 = vld [vmem:[#allocation7 + $0x50] sm:$0xff]  ;;  %v94_v7 = vld [vmem:[#allocation2 + $0x78] sm:$0xff] }
  0x34   :  { %1688 = vmatprep.subr.mxu1 %v413_v1  ;;  %1718 = vmatprep.mubr.f32.mxu1 %v367_v4  ;;  %v92_v8 = vld [vmem:[#allocation2 + $0x68] sm:$0xff]  ;;  %v2093_v9 = vunpack.c.l.bf16 %v94_v7  ;;  %v2095_v10 = vunpack.c.h.bf16 %v94_v7  ;;  %v93_v13 = vld [vmem:[#allocation2 + $0x70] sm:$0xff]  ;;  %v91_v14 = vld [vmem:[#allocation2 + $0x60] sm:$0xff] }
  0x35   :  { %1689 = vmatpush3.msra.mxu1 %v413_v1  ;;  %v2097_v11 = vunpack.c.l.bf16 %v92_v8  ;;  %v2099_v12 = vunpack.c.h.bf16 %v92_v8  ;;  %v408_v15 = vld [vmem:[#allocation7 + $0x48] sm:$0xff]  ;;  %v2101_v16 = vunpack.c.l.bf16 %v93_v13  ;;  %v2103_v17 = vunpack.c.h.bf16 %v93_v13  ;;  %v90_v20 = vld [vmem:[#allocation2 + $0x58] sm:$0xff]  ;;  %v89_v23 = vld [vmem:[#allocation2 + $0x50] sm:$0xff] }
  0x36   :  { %1690 = vmatprep.subr.mxu1 %v412_v2  ;;  %3057 = vst [vmem:[#allocation15_spill] sm:$0xff] %v2093_v9  ;;  %3058 = vst [vmem:[#allocation16_spill] sm:$0xff] %v2095_v10  ;;  %v2105_v18 = vunpack.c.l.bf16 %v91_v14  ;;  %v2107_v19 = vunpack.c.h.bf16 %v91_v14  ;;  %v220_v21 = vadd.f32 %v2095_v10, %v2093_v9  ;;  %v407_v24 = vld [vmem:[#allocation7 + $0x40] sm:$0xff]  ;;  %v2115_v26 = vunpack.c.l.bf16 %v90_v20  ;;  %v406_v28 = vld [vmem:[#allocation7 + $0x38] sm:$0xff] }
  0x37   :  { %1691 = vmatpush3.msra.mxu1 %v412_v2  ;;  %3059 = vst [vmem:[#allocation17_spill] sm:$0xff] %v2097_v11  ;;  %3060 = vst [vmem:[#allocation18_spill] sm:$0xff] %v2099_v12  ;;  %v214_v22 = vadd.f32 %v2099_v12, %v2097_v11  ;;  %v217_v25 = vadd.f32 %v2103_v17, %v2101_v16  ;;  %v2117_v27 = vunpack.c.h.bf16 %v90_v20  ;;  %v2121_v30 = vunpack.c.l.bf16 %v89_v23  ;;  %v88_v32 = vld [vmem:[#allocation2 + $0x48] sm:$0xff]  ;;  %v87_v33 = vld [vmem:[#allocation2 + $0x40] sm:$0xff] }
  0x38   :  { %1692 = vmatprep.subr.mxu1 %v411_v3  ;;  %3061 = vst [vmem:[#allocation19_spill] sm:$0xff] %v2101_v16  ;;  %3062 = vst [vmem:[#allocation20_spill] sm:$0xff] %v2103_v17  ;;  %221 = vadd.xlane.f32.xlu0 %v220_v21  ;;  %v211_v29 = vadd.f32 %v2107_v19, %v2105_v18  ;;  %v2123_v31 = vunpack.c.h.bf16 %v89_v23  ;;  %v405_v34 = vld [vmem:[#allocation7 + $0x30] sm:$0xff]  ;;  %v2127_v36 = vunpack.c.l.bf16 %v88_v32  ;;  %v2129_v37 = vunpack.c.h.bf16 %v88_v32  ;;  %v404_v38 = vld [vmem:[#allocation7 + $0x28] sm:$0xff] }
  0x39   :  { %1693 = vmatpush3.msra.mxu1 %v411_v3  ;;  %3063 = vst [vmem:[#allocation21_spill] sm:$0xff] %v2105_v18  ;;  %3064 = vst [vmem:[#allocation22_spill] sm:$0xff] %v2107_v19  ;;  %215 = vadd.xlane.f32.xlu1 %v214_v22  ;;  %v208_v35 = vadd.f32 %v2117_v27, %v2115_v26  ;;  %v2133_v40 = vunpack.c.l.bf16 %v87_v33  ;;  %v2135_v41 = vunpack.c.h.bf16 %v87_v33  ;;  %v86_v42 = vld [vmem:[#allocation2 + $0x38] sm:$0xff]  ;;  %v85_v43 = vld [vmem:[#allocation2 + $0x30] sm:$0xff] }
  0x3a   :  { %1694 = vmatprep.subr.mxu1 %v410_v5  ;;  %3065 = vst [vmem:[#allocation23_spill] sm:$0xff] %v2115_v26  ;;  %3066 = vst [vmem:[#allocation24_spill] sm:$0xff] %v2117_v27  ;;  %v205_v39 = vadd.f32 %v2123_v31, %v2121_v30  ;;  %v403_v44 = vld [vmem:[#allocation7 + $0x20] sm:$0xff]  ;;  %v202_v45 = vadd.f32 %v2129_v37, %v2127_v36  ;;  %v2139_v46 = vunpack.c.l.bf16 %v86_v42  ;;  %v2141_v47 = vunpack.c.h.bf16 %v86_v42  ;;  %v402_v48 = vld [vmem:[#allocation7 + $0x18] sm:$0xff] }
  0x3b   :  { %1695 = vmatpush3.msra.mxu1 %v410_v5  ;;  %3067 = vst [vmem:[#allocation25_spill] sm:$0xff] %v2121_v30  ;;  %3068 = vst [vmem:[#allocation26_spill] sm:$0xff] %v2123_v31  ;;  %v199_v49 = vadd.f32 %v2135_v41, %v2133_v40  ;;  %v2145_v50 = vunpack.c.l.bf16 %v85_v43  ;;  %v2147_v51 = vunpack.c.h.bf16 %v85_v43  ;;  %v84_v52 = vld [vmem:[#allocation2 + $0x28] sm:$0xff]  ;;  %v83_v53 = vld [vmem:[#allocation2 + $0x20] sm:$0xff] }
  0x3c   :  { %1696 = vmatprep.subr.mxu1 %v409_v6  ;;  %218 = vadd.xlane.f32.xlu0 %v217_v25  ;;  %3069 = vst [vmem:[#allocation27_spill] sm:$0xff] %v2127_v36  ;;  %3070 = vst [vmem:[#allocation28_spill] sm:$0xff] %v2129_v37  ;;  %v401_v54 = vld [vmem:[#allocation7 + $0x10] sm:$0xff]  ;;  %v196_v55 = vadd.f32 %v2141_v47, %v2139_v46  ;;  %v2151_v56 = vunpack.c.l.bf16 %v84_v52  ;;  %v2153_v57 = vunpack.c.h.bf16 %v84_v52  ;;  %v400_v58 = vld [vmem:[#allocation7 + $0x8] sm:$0xff]  ;;  %v2157_v60 = vunpack.c.l.bf16 %v83_v53 }
  0x3d   :  { %1697 = vmatpush3.msra.mxu1 %v409_v6  ;;  %212 = vadd.xlane.f32.xlu1 %v211_v29  ;;  %3071 = vst [vmem:[#allocation29_spill] sm:$0xff] %v2133_v40  ;;  %3072 = vst [vmem:[#allocation30_spill] sm:$0xff] %v2135_v41  ;;  %v193_v59 = vadd.f32 %v2147_v51, %v2145_v50  ;;  %v2159_v61 = vunpack.c.h.bf16 %v83_v53  ;;  %v82_v62 = vld [vmem:[#allocation2 + $0x18] sm:$0xff]  ;;  %v81_v63 = vld [vmem:[#allocation2 + $0x10] sm:$0xff] }
  0x3e   :  { %1698 = vmatprep.subr.mxu1 %v408_v15  ;;  %3073 = vst [vmem:[#allocation31_spill] sm:$0xff] %v2139_v46  ;;  %3074 = vst [vmem:[#allocation32_spill] sm:$0xff] %v2141_v47  ;;  %v399_v0 = vld [vmem:[#allocation7] sm:$0xff]  ;;  %v190_v1 = vadd.f32 %v2153_v57, %v2151_v56  ;;  %v2163_v2 = vunpack.c.l.bf16 %v82_v62  ;;  %v2165_v3 = vunpack.c.h.bf16 %v82_v62  ;;  %v368_v4 = vld [vmem:[#allocation5 + $0x8] sm:$0xff]  ;;  %v2169_v6 = vunpack.c.l.bf16 %v81_v63 }
  0x3f   :  { %1699 = vmatpush3.msra.mxu1 %v408_v15  ;;  %3075 = vst [vmem:[#allocation33_spill] sm:$0xff] %v2145_v50  ;;  %3076 = vst [vmem:[#allocation34_spill] sm:$0xff] %v2147_v51  ;;  %v187_v5 = vadd.f32 %v2159_v61, %v2157_v60  ;;  %v2171_v7 = vunpack.c.h.bf16 %v81_v63  ;;  %v80_v8 = vld [vmem:[#allocation2 + $0x8] sm:$0xff]  ;;  %v369_v13 = vld [vmem:[#allocation5 + $0x10] sm:$0xff] }
  0x40   :  { %1700 = vmatprep.subr.mxu1 %v407_v24  ;;  %209 = vadd.xlane.f32.xlu0 %v208_v35  ;;  %3077 = vst [vmem:[#allocation35_spill] sm:$0xff] %v2151_v56  ;;  %v79_v14 = vld [vmem:[#allocation2] sm:$0xff]  ;;  %v184_v15 = vadd.f32 %v2165_v3, %v2163_v2  ;;  %v2175_v20 = vunpack.c.l.bf16 %v80_v8  ;;  %v2177_v21 = vunpack.c.h.bf16 %v80_v8  ;;  %v370_v22 = vld [vmem:[#allocation5 + $0x18] sm:$0xff]  ;;  %v109_v32 = vld [vmem:[#allocation2 + $0xf0] sm:$0xff] }
  0x41   :  { %1701 = vmatpush3.msra.mxu1 %v407_v24  ;;  %206 = vadd.xlane.f32.xlu1 %v205_v39  ;;  %v181_v23 = vadd.f32 %v2171_v7, %v2169_v6  ;;  %v2181_v24 = vunpack.c.l.bf16 %v79_v14  ;;  %v2183_v25 = vunpack.c.h.bf16 %v79_v14  ;;  %v371_v29 = vld [vmem:[#allocation5 + $0x20] sm:$0xff]  ;;  %v2193_v42 = vunpack.c.l.bf16 %v109_v32  ;;  %v106_v62 = vld [vmem:[#allocation2 + $0xd8] sm:$0xff]  ;;  %v376_v8 = vld [vmem:[#allocation5 + $0x48] sm:$0xff] }
  0x42   :  { %1702 = vmatprep.subr.mxu1 %v406_v28  ;;  %v178_v33 = vadd.f32 %v2177_v21, %v2175_v20  ;;  %v2195_v43 = vunpack.c.h.bf16 %v109_v32  ;;  %v375_v63 = vld [vmem:[#allocation5 + $0x40] sm:$0xff] }
  0x43   :  { %1703 = vmatpush3.msra.mxu1 %v406_v28  ;;  %3078 = vst [vmem:[#allocation36_spill] sm:$0xff] %v2183_v25  ;;  %v110_v28 = vld [vmem:[#allocation2 + $0xf8] sm:$0xff]  ;;  %v175_v39 = vadd.f32 %v2183_v25, %v2181_v24  ;;  %3081 = vst [vmem:[#allocation39_spill] sm:$0xff] %v2193_v42 }
  0x44   :  { %1704 = vmatprep.subr.mxu1 %v405_v34  ;;  %203 = vadd.xlane.f32.xlu0 %v202_v45  ;;  %v2189_v35 = vunpack.c.h.bf16 %v110_v28  ;;  %3082 = vst [vmem:[#allocation40_spill] sm:$0xff] %v2195_v43  ;;  %v373_v45 = vld [vmem:[#allocation5 + $0x30] sm:$0xff] }
  0x45   :  { %1705 = vmatpush3.msra.mxu1 %v405_v34  ;;  %200 = vadd.xlane.f32.xlu1 %v199_v49  ;;  %v2187_v34 = vunpack.c.l.bf16 %v110_v28  ;;  %v103_v28 = vld [vmem:[#allocation2 + $0xc0] sm:$0xff] }
  0x46   :  { %1706 = vmatprep.subr.mxu1 %v404_v38  ;;  %3080 = vst [vmem:[#allocation38_spill] sm:$0xff] %v2189_v35 }
  0x47   :  { %1707 = vmatpush3.msra.mxu1 %v404_v38  ;;  %3079 = vst [vmem:[#allocation37_spill] sm:$0xff] %v2187_v34  ;;  %v372_v38 = vld [vmem:[#allocation5 + $0x28] sm:$0xff]  ;;  %v268_v49 = vadd.f32 %v2189_v35, %v2187_v34  ;;  %v98_v35 = vld [vmem:[#allocation2 + $0x98] sm:$0xff] }
  0x48   :  { %1708 = vmatprep.subr.mxu1 %v403_v44  ;;  %197 = vadd.xlane.f32.xlu0 %v196_v55  ;;  %v265_v55 = vadd.f32 %v2195_v43, %v2193_v42 }
  0x49   :  { %1709 = vmatpush3.msra.mxu1 %v403_v44  ;;  %194 = vadd.xlane.f32.xlu1 %v193_v59  ;;  %v108_v44 = vld [vmem:[#allocation2 + $0xe8] sm:$0xff] }
  0x4a   :  { %1710 = vmatprep.subr.mxu1 %v402_v48  ;;  %v2199_v52 = vunpack.c.l.bf16 %v108_v44  ;;  %v2201_v53 = vunpack.c.h.bf16 %v108_v44  ;;  %v2229_v44 = vunpack.c.l.bf16 %v103_v28 }
  0x4b   :  { %1711 = vmatpush3.msra.mxu1 %v402_v48  ;;  %v107_v48 = vld [vmem:[#allocation2 + $0xe0] sm:$0xff] }
  0x4c   :  { %1712 = vmatprep.subr.mxu1 %v401_v54  ;;  %191 = vadd.xlane.f32.xlu0 %v190_v1  ;;  %3083 = vst [vmem:[#allocation41_spill] sm:$0xff] %v2199_v52  ;;  %3084 = vst [vmem:[#allocation42_spill] sm:$0xff] %v2201_v53  ;;  %v2207_v59 = vunpack.c.h.bf16 %v107_v48  ;;  %v262_v1 = vadd.f32 %v2201_v53, %v2199_v52  ;;  %v96_v53 = vld [vmem:[#allocation2 + $0x88] sm:$0xff] }
  0x4d   :  { %1713 = vmatpush3.msra.mxu1 %v401_v54  ;;  %188 = vadd.xlane.f32.xlu1 %v187_v5  ;;  %v374_v54 = vld [vmem:[#allocation5 + $0x38] sm:$0xff]  ;;  %v2213_v5 = vunpack.c.h.bf16 %v106_v62  ;;  %3093 = vst [vmem:[#allocation51_spill] sm:$0xff] %v2229_v44 }
  0x4e   :  { %1714 = vmatprep.subr.mxu1 %v400_v58  ;;  %3086 = vst [vmem:[#allocation44_spill] sm:$0xff] %v2207_v59 }
  0x4f   :  { %1715 = vmatpush3.msra.mxu1 %v400_v58  ;;  %v2205_v58 = vunpack.c.l.bf16 %v107_v48  ;;  %3088 = vst [vmem:[#allocation46_spill] sm:$0xff] %v2213_v5  ;;  %v102_v48 = vld [vmem:[#allocation2 + $0xb8] sm:$0xff] }
  0x50   :  { %1716 = vmatprep.subr.mxu1 %v399_v0  ;;  %185 = vadd.xlane.f32.xlu0 %v184_v15 }
  0x51   :  { %1717 = vmatpush3.msra.mxu1 %v399_v0  ;;  %182 = vadd.xlane.f32.xlu1 %v181_v23  ;;  %3085 = vst [vmem:[#allocation43_spill] sm:$0xff] %v2205_v58  ;;  %v105_v0 = vld [vmem:[#allocation2 + $0xd0] sm:$0xff] }
  0x52   :  { %1719 = vmatmul.mubr.f32.vlgmr.msra.gmra.mxu1 %v368_v4  ;;  %v2211_v4 = vunpack.c.l.bf16 %v106_v62  ;;  %v2217_v14 = vunpack.c.l.bf16 %v105_v0  ;;  %v2219_v15 = vunpack.c.h.bf16 %v105_v0  ;;  %v377_v23 = vld [vmem:[#allocation5 + $0x50] sm:$0xff]  ;;  %v2235_v62 = vunpack.c.l.bf16 %v102_v48  ;;  %v380_v0 = vld [vmem:[#allocation5 + $0x68] sm:$0xff] }
  0x53   :  { %1721 = vmatprep.mubr.f32.mxu1 %v369_v13  ;;  %v259_v13 = vadd.f32 %v2207_v59, %v2205_v58 }
  0x54   :  { %179 = vadd.xlane.f32.xlu0 %v178_v33  ;;  %3087 = vst [vmem:[#allocation45_spill] sm:$0xff] %v2211_v4  ;;  %3089 = vst [vmem:[#allocation47_spill] sm:$0xff] %v2217_v14 }
  0x55   :  { %176 = vadd.xlane.f32.xlu1 %v175_v39  ;;  %3090 = vst [vmem:[#allocation48_spill] sm:$0xff] %v2219_v15  ;;  %v253_v39 = vadd.f32 %v2219_v15, %v2217_v14  ;;  %3095 = vst [vmem:[#allocation53_spill] sm:$0xff] %v2235_v62  ;;  %v394_v14 = vld [vmem:[#allocation5 + $0xd8] sm:$0xff]  ;;  %v397_v15 = vld [vmem:[#allocation5 + $0xf0] sm:$0xff] }
  0x56   :  { %1722 = vmatmul.mubr.f32.gmra.mxu1 %v370_v22  ;;  %v104_v22 = vld [vmem:[#allocation2 + $0xc8] sm:$0xff] }
  0x57   :  { %1724 = vmatprep.mubr.f32.mxu1 %v371_v29  ;;  %v256_v29 = vadd.f32 %v2213_v5, %v2211_v4  ;;  %v2223_v32 = vunpack.c.l.bf16 %v104_v22  ;;  %v2225_v33 = vunpack.c.h.bf16 %v104_v22  ;;  %v100_v22 = vld [vmem:[#allocation2 + $0xa8] sm:$0xff]  ;;  %v387_v5 = vld [vmem:[#allocation5 + $0xa0] sm:$0xff] }
  0x58   :  { %269 = vadd.xlane.f32.xlu0 %v268_v49  ;;  %v379_v49 = vld [vmem:[#allocation5 + $0x60] sm:$0xff] }
  0x59   :  { %266 = vadd.xlane.f32.xlu1 %v265_v55  ;;  %3091 = vst [vmem:[#allocation49_spill] sm:$0xff] %v2223_v32  ;;  %3092 = vst [vmem:[#allocation50_spill] sm:$0xff] %v2225_v33  ;;  %v250_v55 = vadd.f32 %v2225_v33, %v2223_v32 }
  0x5a   :  { %1725 = vmatmul.mubr.f32.gmra.mxu1 %v372_v38  ;;  %v378_v38 = vld [vmem:[#allocation5 + $0x58] sm:$0xff] }
  0x5b   :  { %1727 = vmatprep.mubr.f32.mxu1 %v373_v45  ;;  %v2231_v45 = vunpack.c.h.bf16 %v103_v28  ;;  %v99_v28 = vld [vmem:[#allocation2 + $0xa0] sm:$0xff] }
  0x5c   :  { %263 = vadd.xlane.f32.xlu0 %v262_v1  ;;  %v2255_v34 = vunpack.c.h.bf16 %v99_v28 }
  0x5d   :  { %260 = vadd.xlane.f32.xlu1 %v259_v13  ;;  %3094 = vst [vmem:[#allocation52_spill] sm:$0xff] %v2231_v45  ;;  %v247_v1 = vadd.f32 %v2231_v45, %v2229_v44 }
  0x5e   :  { %1728 = vmatmul.mubr.f32.gmra.mxu1 %v374_v54  ;;  %v101_v54 = vld [vmem:[#allocation2 + $0xb0] sm:$0xff]  ;;  %3102 = vst [vmem:[#allocation60_spill] sm:$0xff] %v2255_v34 }
  0x5f   :  { %1730 = vmatprep.mubr.f32.mxu1 %v375_v63  ;;  %v2237_v63 = vunpack.c.h.bf16 %v102_v48  ;;  %v2243_v13 = vunpack.c.h.bf16 %v101_v54  ;;  %v2249_v48 = vunpack.c.h.bf16 %v100_v22 }
  0x60   :  { %257 = vadd.xlane.f32.xlu0 %v256_v29 }
  0x61   :  { %3096 = vst [vmem:[#allocation54_spill] sm:$0xff] %v2237_v63  ;;  %254 = vadd.xlane.f32.xlu1 %v253_v39  ;;  %3098 = vst [vmem:[#allocation56_spill] sm:$0xff] %v2243_v13  ;;  %v244_v29 = vadd.f32 %v2237_v63, %v2235_v62  ;;  %v382_v39 = vld [vmem:[#allocation5 + $0x78] sm:$0xff] }
  0x62   :  { %1731 = vmatmul.mubr.f32.gmra.mxu1 %v376_v8  ;;  %v2241_v8 = vunpack.c.l.bf16 %v101_v54  ;;  %3100 = vst [vmem:[#allocation58_spill] sm:$0xff] %v2249_v48  ;;  %v2253_v54 = vunpack.c.l.bf16 %v99_v28 }
  0x63   :  { %1733 = vmatprep.mubr.f32.mxu1 %v377_v23  ;;  %v381_v23 = vld [vmem:[#allocation5 + $0x70] sm:$0xff] }
  0x64   :  { %3097 = vst [vmem:[#allocation55_spill] sm:$0xff] %v2241_v8  ;;  %251 = vadd.xlane.f32.xlu0 %v250_v55  ;;  %3101 = vst [vmem:[#allocation59_spill] sm:$0xff] %v2253_v54  ;;  %v97_v55 = vld [vmem:[#allocation2 + $0x90] sm:$0xff]  ;;  %v235_v43 = vadd.f32 %v2255_v34, %v2253_v54 }
  0x65   :  { %248 = vadd.xlane.f32.xlu1 %v247_v1  ;;  %v384_v1 = vld [vmem:[#allocation5 + $0x88] sm:$0xff]  ;;  %v2265_v28 = vunpack.c.l.bf16 %v97_v55  ;;  %v2267_v52 = vunpack.c.h.bf16 %v97_v55 }
  0x66   :  { %1734 = vmatmul.mubr.f32.gmra.mxu1 %v378_v38  ;;  %v2247_v38 = vunpack.c.l.bf16 %v100_v22  ;;  %v2259_v22 = vunpack.c.l.bf16 %v98_v35 }
  0x67   :  { %1736 = vmatprep.mubr.f32.mxu1 %v379_v49  ;;  %v241_v49 = vadd.f32 %v2243_v13, %v2241_v8  ;;  %3105 = vst [vmem:[#allocation63_spill] sm:$0xff] %v2265_v28  ;;  %3106 = vst [vmem:[#allocation64_spill] sm:$0xff] %v2267_v52  ;;  %v229_v59 = vadd.f32 %v2267_v52, %v2265_v28 }
  0x68   :  { %3099 = vst [vmem:[#allocation57_spill] sm:$0xff] %v2247_v38  ;;  %245 = vadd.xlane.f32.xlu0 %v244_v29  ;;  %v238_v42 = vadd.f32 %v2249_v48, %v2247_v38  ;;  %3103 = vst [vmem:[#allocation61_spill] sm:$0xff] %v2259_v22  ;;  %v95_v29 = vld [vmem:[#allocation2 + $0x80] sm:$0xff] }
  0x69   :  { %242 = vadd.xlane.f32.xlu1 %v241_v49  ;;  %v386_v49 = vld [vmem:[#allocation5 + $0x98] sm:$0xff]  ;;  %v2277_v55 = vunpack.c.l.bf16 %v95_v29  ;;  %v2279_v4 = vunpack.c.h.bf16 %v95_v29  ;;  %v391_v29 = vld [vmem:[#allocation5 + $0xc0] sm:$0xff] }
  0x6a   :  { %1737 = vmatmul.mubr.f32.gmra.mxu1 %v380_v0  ;;  %v383_v0 = vld [vmem:[#allocation5 + $0x80] sm:$0xff] }
  0x6b   :  { %1739 = vmatprep.mubr.f32.mxu1 %v381_v23  ;;  %v2261_v23 = vunpack.c.h.bf16 %v98_v35  ;;  %v2271_v35 = vunpack.c.l.bf16 %v96_v53  ;;  %3109 = vst [vmem:[#allocation67_spill] sm:$0xff] %v2277_v55  ;;  %3110 = vst [vmem:[#allocation68_spill] sm:$0xff] %v2279_v4 }
  0x6c   :  { %239 = vadd.xlane.f32.xlu0 %v238_v42 }
  0x6d   :  { %3104 = vst [vmem:[#allocation62_spill] sm:$0xff] %v2261_v23  ;;  %v232_v58 = vadd.f32 %v2261_v23, %v2259_v22  ;;  %3107 = vst [vmem:[#allocation65_spill] sm:$0xff] %v2271_v35  ;;  %236 = vadd.xlane.f32.xlu1 %v235_v43  ;;  %v389_v43 = vld [vmem:[#allocation5 + $0xb0] sm:$0xff] }
  0x6e   :  { %1740 = vmatmul.mubr.f32.gmra.mxu1 %v382_v39  ;;  %v385_v39 = vld [vmem:[#allocation5 + $0x90] sm:$0xff] }
  0x6f   :  { %1742 = vmatprep.mubr.f32.mxu1 %v383_v0  ;;  %v2273_v0 = vunpack.c.h.bf16 %v96_v53  ;;  %v223_v53 = vadd.f32 %v2279_v4, %v2277_v55 }
  0x70   :  { %233 = vadd.xlane.f32.xlu0 %v232_v58  ;;  %v393_v58 = vld [vmem:[#allocation5 + $0xd0] sm:$0xff] }
  0x71   :  { %3108 = vst [vmem:[#allocation66_spill] sm:$0xff] %v2273_v0  ;;  %v226_v42 = vadd.f32 %v2273_v0, %v2271_v35  ;;  %230 = vadd.xlane.f32.xlu1 %v229_v59  ;;  %v396_v59 = vld [vmem:[#allocation5 + $0xe8] sm:$0xff] }
  0x72   :  { %1743 = vmatmul.mubr.f32.gmra.mxu1 %v384_v1  ;;  %v388_v1 = vld [vmem:[#allocation5 + $0xa8] sm:$0xff] }
  0x73   :  { %1745 = vmatprep.mubr.f32.mxu1 %v385_v39  ;;  %v390_v39 = vld [vmem:[#allocation5 + $0xb8] sm:$0xff] }
  0x74   :  { %227 = vadd.xlane.f32.xlu0 %v226_v42  ;;  %v2960_v42 = vmov 0.0  }
  0x75   :  { %224 = vadd.xlane.f32.xlu1 %v223_v53  ;;  %672 = vmatprep.subr.mxu1 %v2960_v42 }
  0x76   :  { %1746 = vmatmul.mubr.f32.gmra.mxu1 %v386_v49  ;;  %v392_v49 = vld [vmem:[#allocation5 + $0xc8] sm:$0xff] }
  0x77   :  { %1748 = vmatprep.mubr.f32.mxu1 %v387_v5  ;;  %v395_v5 = vld [vmem:[#allocation5 + $0xe0] sm:$0xff] }
  0x7a   :  { %1749 = vmatmul.mubr.f32.gmra.mxu1 %v388_v1  ;;  %v398_v1 = vld [vmem:[#allocation5 + $0xf8] sm:$0xff] }
  0x7b   :  { %1751 = vmatprep.mubr.f32.mxu1 %v389_v43 }
  0x7e   :  { %1752 = vmatmul.mubr.f32.gmra.mxu1 %v390_v39 }
  0x7f   :  { %1754 = vmatprep.mubr.f32.mxu1 %v391_v29 }
  0x82   :  { %1755 = vmatmul.mubr.f32.gmra.mxu1 %v392_v49 }
  0x83   :  { %1757 = vmatprep.mubr.f32.mxu1 %v393_v58 }
  0x86   :  { %1758 = vmatmul.mubr.f32.gmra.mxu1 %v394_v14 }
  0x87   :  { %1760 = vmatprep.mubr.f32.mxu1 %v395_v5 }
  0x8a   :  { %1761 = vmatmul.mubr.f32.gmra.mxu1 %v396_v59 }
  0x8b   :  { %1763 = vmatprep.mubr.f32.mxu1 %v397_v15 }
  0x8e   :  { %1764 = vmatmul.mubr.f32.gmra.mxu1 %v398_v1 }
  0x8f   :  { %736 = vmatprep.mubr.f32.mxu1 %v2183_v25 }
  0xc1   :  { %v222_v53 = vpop.xlane.xlu0 %221 }
  0xc2   :  { %v216_v43 = vpop.xlane.xlu1 %215  ;;  %1854 = vrsqrt.f32 %v222_v53  ;;  %vm286_vm0 = vcmp.gt.f32.partialorder %v222_v53, 0.0 }
  0xc3   :  { %vm284_vm2 = vcmp.gt.f32.partialorder %v216_v43, 0.0 }
  0xc5   :  { %v219_v39 = vpop.xlane.xlu0 %218 }
  0xc6   :  { %v2287_v29 = vpop.xlane.xlu1 %212  ;;  %1856 = vrsqrt.f32 %v219_v39  ;;  %vm285_vm1 = vcmp.gt.f32.partialorder %v219_v39, 0.0 }
  0xc7   :  { %1858 = vrsqrt.f32 %v216_v43  ;;  %vm283_vm3 = vcmp.gt.f32.partialorder %v2287_v29, 0.0 }
  0xc8   :  { %1860 = vrsqrt.f32 %v2287_v29 }
  0xc9   :  { %v2289_v49 = vpop.xlane.xlu0 %209 }
  0xca   :  { %v2291_v14 = vpop.xlane.xlu1 %206  ;;  %1862 = vrsqrt.f32 %v2289_v49  ;;  %vm282_vm4 = vcmp.gt.f32.partialorder %v2289_v49, 0.0 }
  0xcb   :  { %1864 = vrsqrt.f32 %v2291_v14  ;;  %vm281_vm5 = vcmp.gt.f32.partialorder %v2291_v14, 0.0 }
  0xcd   :  { %v2293_v58 = vpop.xlane.xlu0 %203 }
  0xce   :  { %v2295_v5 = vpop.xlane.xlu1 %200  ;;  %1866 = vrsqrt.f32 %v2293_v58  ;;  %vm280_vm6 = vcmp.gt.f32.partialorder %v2293_v58, 0.0 }
  0xcf   :  { %1868 = vrsqrt.f32 %v2295_v5  ;;  %v1855_v35 = vpop.eup %1854  ;;  %vm279_vm7 = vcmp.gt.f32.partialorder %v2295_v5, 0.0 }
  0xd0   :  { %v2343_v10 = vsel %vm286_vm0, %v1855_v35, 0.0 }
  0xd1   :  { %v2299_v59 = vpop.xlane.xlu0 %197  ;;  %3111 = vst [vmem:[#allocation69_spill] sm:$0xff] %v2343_v10 }
  0xd2   :  { %v2303_v42 = vpop.xlane.xlu1 %194  ;;  %1870 = vrsqrt.f32 %v2299_v59  ;;  %vm278_vm8 = vcmp.gt.f32.partialorder %v2299_v59, 0.0 }
  0xd3   :  { %v1857_v4 = vpop.eup %1856  ;;  %1872 = vrsqrt.f32 %v2303_v42  ;;  %vm277_vm9 = vcmp.gt.f32.partialorder %v2303_v42, 0.0 }
  0xd4   :  { %v1859_v17 = vpop.eup %1858  ;;  %v2347_v53 = vsel %vm285_vm1, %v1857_v4, 0.0  ;;  %v3114_v4 = vmov 0.0  }
  0xd5   :  { %v2309_v33 = vpop.xlane.xlu0 %191  ;;  %v1861_v12 = vpop.eup %1860  ;;  %3112 = vst [vmem:[#allocation70_spill] sm:$0xff] %v2347_v53  ;;  %v2355_v26 = vsel %vm284_vm2, %v1859_v17, 0.0 }
  0xd6   :  { %v2313_v45 = vpop.xlane.xlu1 %188  ;;  %1874 = vrsqrt.f32 %v2309_v33  ;;  %3113 = vst [vmem:[#allocation71_spill] sm:$0xff] %v2355_v26  ;;  %v2365_v49 = vsel %vm283_vm3, %v1861_v12, 0.0  ;;  %vm276_vm10 = vcmp.gt.f32.partialorder %v2309_v33, 0.0 }
  0xd7   :  { %v1863_v19 = vpop.eup %1862  ;;  %1876 = vrsqrt.f32 %v2313_v45  ;;  %3115 = vst [vmem:[#allocation72_spill] sm:$0xff] %v2365_v49  ;;  %vm275_vm11 = vcmp.gt.f32.partialorder %v2313_v45, 0.0 }
  0xd8   :  { %v1865_v43 = vpop.eup %1864 }
  0xd9   :  { %v2319_v8 = vpop.xlane.xlu0 %185 }
  0xda   :  { %v2323_v38 = vpop.xlane.xlu1 %182  ;;  %1878 = vrsqrt.f32 %v2319_v8  ;;  %vm274_vm12 = vcmp.gt.f32.partialorder %v2319_v8, 0.0 }
  0xdb   :  { %v1867_v17 = vpop.eup %1866  ;;  %1880 = vrsqrt.f32 %v2323_v38  ;;  %vm273_vm13 = vcmp.gt.f32.partialorder %v2323_v38, 0.0 }
  0xdc   :  { %v2385_v58 = vsel %vm280_vm6, %v1867_v17, 0.0 }
  0xdd   :  { %v2331_v34 = vpop.xlane.xlu0 %179  ;;  %3118 = vst [vmem:[#allocation75_spill] sm:$0xff] %v2385_v58 }
  0xde   :  { %v2334_v23 = vpop.xlane.xlu1 %176  ;;  %1882 = vrsqrt.f32 %v2331_v34  ;;  %vm272_vm14 = vcmp.gt.f32.partialorder %v2331_v34, 0.0 }
  0xdf   :  { %1884 = vrsqrt.f32 %v2334_v23  ;;  %vm271_vm15 = vcmp.gt.f32.partialorder %v2334_v23, 0.0 }
  0xe1   :  { %v2338_v0 = vpop.xlane.xlu0 %269 }
  0xe2   :  { %v2341_v9 = vpop.xlane.xlu1 %266  ;;  %1886 = vrsqrt.f32 %v2338_v0  ;;  %vm302_vm0 = vcmp.gt.f32.partialorder %v2338_v0, 0.0 }
  0xe3   :  { %1888 = vrsqrt.f32 %v2341_v9  ;;  %vm301_vm1 = vcmp.gt.f32.partialorder %v2341_v9, 0.0 }
  0xe5   :  { %v2352_v35 = vpop.xlane.xlu0 %263 }
  0xe6   :  { %1890 = vrsqrt.f32 %v2352_v35  ;;  %vm300_vm2 = vcmp.gt.f32.partialorder %v2352_v35, 0.0 }
 0x112   :  { %v2297_v15 = vpop.f32.mrf.mxu1 }
 0x114   :  { %v2301_v1 = vpop.f32.mrf.mxu1 }
 0x116   :  { %v2305_v25 = vpop.f32.mrf.mxu1 }
 0x118   :  { %v2307_v32 = vpop.f32.mrf.mxu1 }
 0x11a   :  { %v2311_v44 = vpop.f32.mrf.mxu1 }
 0x11c   :  { %v2315_v62 = vpop.f32.mrf.mxu1 }
 0x11e   :  { %v2317_v63 = vpop.f32.mrf.mxu1 }
 0x120   :  { %v2321_v13 = vpop.f32.mrf.mxu1 }
 0x122   :  { %v2325_v48 = vpop.f32.mrf.mxu1 }
 0x124   :  { %v2329_v54 = vpop.f32.mrf.mxu1 }
 0x126   :  { %v1735_v22 = vpop.f32.mrf.mxu1 }
 0x128   :  { %v531_v28 = vpop.f32.mrf.mxu1 }
 0x12a   :  { %v1738_v52 = vpop.f32.mrf.mxu1 }
 0x12b   :  { %v653_v29 = vmul.f32 %v1738_v52, %v2355_v26  ;;  %v2382_v52 = vpop.xlane.xlu0 %257 }
 0x12c   :  { %v541_v55 = vpop.f32.mrf.mxu1 }
 0x12d   :  { %v652_v14 = vmul.f32 %v541_v55, %v2365_v49 }
 0x12e   :  { %v1741_v16 = vpop.f32.mrf.mxu1 }
 0x12f   :  { %v655_v11 = vmul.f32 %v1741_v16, %v2343_v10  ;;  %v2362_v10 = vpop.xlane.xlu1 %260 }
 0x130   :  { %v551_v18 = vpop.f32.mrf.mxu1  ;;  %1892 = vrsqrt.f32 %v2362_v10  ;;  %vm299_vm3 = vcmp.gt.f32.partialorder %v2362_v10, 0.0 }
 0x131   :  { %v654_v39 = vmul.f32 %v551_v18, %v2347_v53  ;;  %673 = vmatpush1.msra.mxu1 %v655_v11  ;;  %v2367_v18 = vsel %vm282_vm4, %v1863_v19, 0.0  ;;  %v2375_v53 = vsel %vm281_vm5, %v1865_v43, 0.0  ;;  %v1869_v19 = vpop.eup %1868  ;;  %1894 = vrsqrt.f32 %v2382_v52 }
 0x132   :  { %v2358_v16 = vpop.f32.mrf.mxu1  ;;  %674 = vmatprep.subr.mxu1 %v3114_v4  ;;  %3116 = vst [vmem:[#allocation73_spill] sm:$0xff] %v2367_v18  ;;  %3117 = vst [vmem:[#allocation74_spill] sm:$0xff] %v2375_v53  ;;  %v1871_v43 = vpop.eup %1870  ;;  %v650_v5 = vmul.f32 %v531_v28, %v2375_v53  ;;  %v2395_v26 = vsel %vm279_vm7, %v1869_v19, 0.0  ;;  %vm298_vm4 = vcmp.gt.f32.partialorder %v2382_v52, 0.0 }
 0x133   :  { %675 = vmatpush1.msra.mxu1 %v654_v39  ;;  %v651_v39 = vmul.f32 %v1735_v22, %v2367_v18  ;;  %3119 = vst [vmem:[#allocation76_spill] sm:$0xff] %v2395_v26  ;;  %v1873_v17 = vpop.eup %1872  ;;  %v2404_v59 = vsel %vm278_vm8, %v1871_v43, 0.0  ;;  %v2410_v19 = vpop.xlane.xlu0 %251 }
 0x134   :  { %v2370_v11 = vpop.f32.mrf.mxu1  ;;  %676 = vmatprep.subr.mxu1 %v3114_v4  ;;  %3120 = vst [vmem:[#allocation77_spill] sm:$0xff] %v2404_v59  ;;  %v1875_v28 = vpop.eup %1874  ;;  %v2414_v42 = vsel %vm277_vm9, %v1873_v17, 0.0  ;;  %v647_v33 = vmul.f32 %v2317_v63, %v2404_v59  ;;  %vm296_vm6 = vcmp.gt.f32.partialorder %v2410_v19, 0.0 }
 0x135   :  { %677 = vmatpush1.msra.mxu1 %v653_v29  ;;  %v2392_v29 = vpop.xlane.xlu1 %254  ;;  %3121 = vst [vmem:[#allocation78_spill] sm:$0xff] %v2414_v42  ;;  %v1877_v43 = vpop.eup %1876  ;;  %v2425_v18 = vsel %vm276_vm10, %v1875_v28, 0.0  ;;  %v646_v45 = vmul.f32 %v2321_v13, %v2414_v42 }
 0x136   :  { %v2378_v12 = vpop.f32.mrf.mxu1  ;;  %678 = vmatprep.subr.mxu1 %v3114_v4  ;;  %3122 = vst [vmem:[#allocation79_spill] sm:$0xff] %v2425_v18  ;;  %v1879_v17 = vpop.eup %1878  ;;  %v645_v8 = vmul.f32 %v2311_v44, %v2425_v18  ;;  %1896 = vrsqrt.f32 %v2392_v29  ;;  %vm297_vm5 = vcmp.gt.f32.partialorder %v2392_v29, 0.0 }
 0x137   :  { %679 = vmatpush1.msra.mxu1 %v652_v14  ;;  %v649_v14 = vmul.f32 %v2325_v48, %v2385_v58  ;;  %v1881_v28 = vpop.eup %1880  ;;  %v2446_v13 = vsel %vm274_vm12, %v1879_v17, 0.0  ;;  %1898 = vrsqrt.f32 %v2410_v19 }
 0x138   :  { %v2388_v55 = vpop.f32.mrf.mxu1  ;;  %680 = vmatprep.subr.mxu1 %v3114_v4  ;;  %v2457_v58 = vsel %vm273_vm13, %v1881_v28, 0.0  ;;  %v643_v34 = vmul.f32 %v2305_v25, %v2446_v13 }
 0x139   :  { %681 = vmatpush1.msra.mxu1 %v651_v39  ;;  %v648_v39 = vmul.f32 %v2329_v54, %v2395_v26  ;;  %v642_v28 = vmul.f32 %v2307_v32, %v2457_v58 }
 0x13a   :  { %v2398_v22 = vpop.f32.mrf.mxu1  ;;  %682 = vmatprep.subr.mxu1 %v3114_v4 }
 0x13b   :  { %683 = vmatpush1.msra.mxu1 %v650_v5  ;;  %v2421_v5 = vpop.xlane.xlu1 %248 }
 0x13c   :  { %v2406_v49 = vpop.f32.mrf.mxu1  ;;  %684 = vmatprep.subr.mxu1 %v3114_v4  ;;  %1900 = vrsqrt.f32 %v2421_v5  ;;  %vm295_vm7 = vcmp.gt.f32.partialorder %v2421_v5, 0.0 }
 0x13d   :  { %685 = vmatpush1.msra.mxu1 %v649_v14  ;;  %v2434_v14 = vsel %vm275_vm11, %v1877_v43, 0.0 }
 0x13e   :  { %v2417_v48 = vpop.f32.mrf.mxu1  ;;  %686 = vmatprep.subr.mxu1 %v3114_v4  ;;  %v644_v53 = vmul.f32 %v2315_v62, %v2434_v14 }
 0x13f   :  { %687 = vmatpush1.msra.mxu1 %v648_v39  ;;  %v2442_v39 = vpop.xlane.xlu0 %245  ;;  %v2453_v38 = vpop.xlane.xlu1 %242 }
 0x140   :  { %v2428_v54 = vpop.f32.mrf.mxu1  ;;  %688 = vmatprep.subr.mxu1 %v3114_v4  ;;  %1902 = vrsqrt.f32 %v2442_v39  ;;  %vm294_vm8 = vcmp.gt.f32.partialorder %v2442_v39, 0.0  ;;  %vm293_vm9 = vcmp.gt.f32.partialorder %v2453_v38, 0.0 }
 0x141   :  { %689 = vmatpush1.msra.mxu1 %v647_v33  ;;  %v1883_v33 = vpop.eup %1882  ;;  %1904 = vrsqrt.f32 %v2453_v38 }
 0x142   :  { %v2437_v63 = vpop.f32.mrf.mxu1  ;;  %690 = vmatprep.subr.mxu1 %v3114_v4  ;;  %v1885_v17 = vpop.eup %1884 }
 0x143   :  { %691 = vmatpush1.msra.mxu1 %v646_v45  ;;  %v2466_v45 = vsel %vm272_vm14, %v1883_v33, 0.0  ;;  %v2476_v26 = vsel %vm271_vm15, %v1885_v17, 0.0  ;;  %v1887_v23 = vpop.eup %1886  ;;  %v2483_v33 = vpop.xlane.xlu1 %236 }
 0x144   :  { %v2449_v43 = vpop.f32.mrf.mxu1  ;;  %692 = vmatprep.subr.mxu1 %v3114_v4  ;;  %v1889_v17 = vpop.eup %1888  ;;  %v2490_v59 = vsel %vm302_vm0, %v1887_v23, 0.0  ;;  %vm291_vm11 = vcmp.gt.f32.partialorder %v2483_v33, 0.0 }
 0x145   :  { %693 = vmatpush1.msra.mxu1 %v645_v8  ;;  %v2474_v8 = vpop.xlane.xlu0 %239  ;;  %3123 = vst [vmem:[#allocation80_spill] sm:$0xff] %v2490_v59  ;;  %v2498_v18 = vsel %vm301_vm1, %v1889_v17, 0.0 }
 0x146   :  { %v2460_v44 = vpop.f32.mrf.mxu1  ;;  %694 = vmatprep.subr.mxu1 %v3114_v4  ;;  %1906 = vrsqrt.f32 %v2474_v8  ;;  %vm292_vm10 = vcmp.gt.f32.partialorder %v2474_v8, 0.0 }
 0x147   :  { %695 = vmatpush1.msra.mxu1 %v644_v53  ;;  %v641_v53 = vmul.f32 %v2297_v15, %v2466_v45  ;;  %v1891_v15 = vpop.eup %1890  ;;  %1908 = vrsqrt.f32 %v2483_v33 }
 0x148   :  { %v2469_v62 = vpop.f32.mrf.mxu1  ;;  %696 = vmatprep.subr.mxu1 %v3114_v4  ;;  %v1893_v9 = vpop.eup %1892 }
 0x149   :  { %697 = vmatpush1.msra.mxu1 %v643_v34  ;;  %v640_v34 = vmul.f32 %v2301_v1, %v2476_v26  ;;  %v1895_v23 = vpop.eup %1894  ;;  %v2513_v10 = vsel %vm299_vm3, %v1893_v9, 0.0 }
 0x14a   :  { %v1762_v25 = vpop.f32.mrf.mxu1  ;;  %698 = vmatprep.subr.mxu1 %v3114_v4  ;;  %v1897_v17 = vpop.eup %1896  ;;  %v2515_v52 = vsel %vm298_vm4, %v1895_v23, 0.0 }
 0x14b   :  { %699 = vmatpush1.msra.mxu1 %v642_v28  ;;  %v2495_v28 = vpop.xlane.xlu0 %233  ;;  %v667_v9 = vmul.f32 %v2460_v44, %v2515_v52 }
 0x14c   :  { %v621_v32 = vpop.f32.mrf.mxu1  ;;  %700 = vmatprep.subr.mxu1 %v3114_v4  ;;  %1910 = vrsqrt.f32 %v2495_v28  ;;  %vm290_vm12 = vcmp.gt.f32.partialorder %v2495_v28, 0.0 }
 0x14d   :  { %701 = vmatpush1.msra.mxu1 %v641_v53  ;;  %v2504_v53 = vpop.xlane.xlu1 %230 }
 0x14e   :  { %v1765_v0 = vpop.f32.mrf.mxu1  ;;  %702 = vmatprep.subr.mxu1 %v3114_v4  ;;  %1912 = vrsqrt.f32 %v2504_v53  ;;  %vm289_vm13 = vcmp.gt.f32.partialorder %v2504_v53, 0.0 }
 0x14f   :  { %v671_v42 = vmul.f32 %v1765_v0, %v2490_v59  ;;  %703 = vmatpush1.msra.mxu1 %v640_v34  ;;  %v2507_v0 = vsel %vm300_vm2, %v1891_v15, 0.0  ;;  %v228_v15 = vpop.xlane.xlu0 %227  ;;  %v2521_v59 = vsel %vm297_vm5, %v1897_v17, 0.0 }
 0x150   :  { %v631_v1 = vpop.f32.mrf.mxu1  ;;  %704 = vmatprep.subr.mxu1 %v3114_v4  ;;  %v669_v34 = vmul.f32 %v1762_v25, %v2507_v0  ;;  %1914 = vrsqrt.f32 %v228_v15  ;;  %vm288_vm14 = vcmp.gt.f32.partialorder %v228_v15, 0.0 }
 0x151   :  { %v670_v35 = vmul.f32 %v631_v1, %v2498_v18  ;;  %705 = vmatpush2.msra.mxu1 %v671_v42  ;;  %v1899_v42 = vpop.eup %1898  ;;  %v668_v1 = vmul.f32 %v621_v32, %v2513_v10  ;;  %v225_v25 = vpop.xlane.xlu1 %224  ;;  %v666_v32 = vmul.f32 %v2469_v62, %v2521_v59 }
 0x152   :  { %706 = vmatprep.subr.mxu1 %v3114_v4  ;;  %v1901_v29 = vpop.eup %1900  ;;  %v2528_v23 = vsel %vm296_vm6, %v1899_v42, 0.0  ;;  %1916 = vrsqrt.f32 %v225_v25  ;;  %vm287_vm15 = vcmp.gt.f32.partialorder %v225_v25, 0.0  ;;  %v982_v25 = vld [vmem:[#allocation8 + $0x70] sm:$0xff] }
 0x153   :  { %707 = vmatpush2.msra.mxu1 %v670_v35  ;;  %v1903_v19 = vpop.eup %1902  ;;  %v2534_v35 = vsel %vm295_vm7, %v1901_v29, 0.0  ;;  %v665_v44 = vmul.f32 %v2437_v63, %v2528_v23 }
 0x154   :  { %708 = vmatprep.subr.mxu1 %v3114_v4  ;;  %v1905_v5 = vpop.eup %1904  ;;  %v2540_v17 = vsel %vm294_vm8, %v1903_v19, 0.0  ;;  %v664_v62 = vmul.f32 %v2449_v43, %v2534_v35 }
 0x155   :  { %709 = vmatpush2.msra.mxu1 %v669_v34  ;;  %v1907_v39 = vpop.eup %1906  ;;  %v2546_v34 = vsel %vm293_vm9, %v1905_v5, 0.0  ;;  %v663_v63 = vmul.f32 %v2417_v48, %v2540_v17 }
 0x156   :  { %710 = vmatprep.subr.mxu1 %v3114_v4  ;;  %v1909_v38 = vpop.eup %1908  ;;  %v2552_v42 = vsel %vm292_vm10, %v1907_v39, 0.0  ;;  %v662_v43 = vmul.f32 %v2428_v54, %v2546_v34  ;;  %v977_v39 = vld [vmem:[#allocation8 + $0x48] sm:$0xff] }
 0x157   :  { %711 = vmatpush2.msra.mxu1 %v668_v1  ;;  %v2558_v1 = vsel %vm291_vm11, %v1909_v38, 0.0  ;;  %v661_v48 = vmul.f32 %v2398_v22, %v2552_v42  ;;  %v975_v38 = vld [vmem:[#allocation8 + $0x38] sm:$0xff] }
 0x158   :  { %712 = vmatprep.subr.mxu1 %v3114_v4  ;;  %v660_v54 = vmul.f32 %v2406_v49, %v2558_v1 }
 0x159   :  { %713 = vmatpush2.msra.mxu1 %v667_v9  ;;  %v1911_v8 = vpop.eup %1910 }
 0x15a   :  { %714 = vmatprep.subr.mxu1 %v3114_v4  ;;  %v2564_v29 = vsel %vm290_vm12, %v1911_v8, 0.0  ;;  %v973_v8 = vld [vmem:[#allocation8 + $0x28] sm:$0xff] }
 0x15b   :  { %715 = vmatpush2.msra.mxu1 %v666_v32  ;;  %v1913_v33 = vpop.eup %1912  ;;  %v659_v22 = vmul.f32 %v2378_v12, %v2564_v29  ;;  %v983_v12 = vld [vmem:[#allocation8 + $0x78] sm:$0xff] }
 0x15c   :  { %716 = vmatprep.subr.mxu1 %v3114_v4  ;;  %v2569_v9 = vsel %vm289_vm13, %v1913_v33, 0.0  ;;  %1766 = vmatprep.subr.mxu0 %v983_v12  ;;  %v3124_v33 = vld [vmem:[#allocation23_spill] sm:$0xff] }
 0x15d   :  { %717 = vmatpush2.msra.mxu1 %v665_v44  ;;  %v1915_v28 = vpop.eup %1914  ;;  %v658_v15 = vmul.f32 %v2388_v55, %v2569_v9  ;;  %1767 = vmatpush3.msra.mxu0 %v983_v12  ;;  %v981_v55 = vld [vmem:[#allocation8 + $0x68] sm:$0xff]  ;;  %v979_v44 = vld [vmem:[#allocation8 + $0x58] sm:$0xff]  ;;  %v3132_v12 = vld [vmem:[#allocation15_spill] sm:$0xff] }
 0x15e   :  { %718 = vmatprep.subr.mxu1 %v3114_v4  ;;  %v2574_v53 = vsel %vm288_vm14, %v1915_v28, 0.0  ;;  %1768 = vmatprep.subr.mxu0 %v982_v25  ;;  %v3126_v28 = vld [vmem:[#allocation21_spill] sm:$0xff] }
 0x15f   :  { %719 = vmatpush2.msra.mxu1 %v664_v62  ;;  %v1917_v19 = vpop.eup %1916  ;;  %v657_v32 = vmul.f32 %v2358_v16, %v2574_v53  ;;  %1769 = vmatpush3.msra.mxu0 %v982_v25  ;;  %v980_v16 = vld [vmem:[#allocation8 + $0x60] sm:$0xff]  ;;  %v3133_v25 = vld [vmem:[#allocation68_spill] sm:$0xff] }
 0x160   :  { %720 = vmatprep.subr.mxu1 %v3114_v4  ;;  %v2579_v49 = vsel %vm287_vm15, %v1917_v19, 0.0  ;;  %1770 = vmatprep.subr.mxu0 %v981_v55  ;;  %v976_v62 = vld [vmem:[#allocation8 + $0x40] sm:$0xff]  ;;  %v3128_v19 = vld [vmem:[#allocation17_spill] sm:$0xff] }
 0x161   :  { %721 = vmatpush2.msra.mxu1 %v663_v63  ;;  %v656_v5 = vmul.f32 %v2370_v11, %v2579_v49  ;;  %1771 = vmatpush3.msra.mxu0 %v981_v55  ;;  %v978_v11 = vld [vmem:[#allocation8 + $0x50] sm:$0xff]  ;;  %v971_v55 = vld [vmem:[#allocation8 + $0x18] sm:$0xff] }
 0x162   :  { %722 = vmatprep.subr.mxu1 %v3114_v4  ;;  %1772 = vmatprep.subr.mxu0 %v980_v16  ;;  %v974_v63 = vld [vmem:[#allocation8 + $0x30] sm:$0xff] }
 0x163   :  { %723 = vmatpush2.msra.mxu1 %v662_v43  ;;  %1773 = vmatpush3.msra.mxu0 %v980_v16  ;;  %v972_v43 = vld [vmem:[#allocation8 + $0x20] sm:$0xff]  ;;  %v3135_v16 = vld [vmem:[#allocation66_spill] sm:$0xff] }
 0x164   :  { %724 = vmatprep.subr.mxu1 %v3114_v4  ;;  %1774 = vmatprep.subr.mxu0 %v979_v44 }
 0x165   :  { %725 = vmatpush2.msra.mxu1 %v661_v48  ;;  %1775 = vmatpush3.msra.mxu0 %v979_v44  ;;  %v3125_v48 = vld [vmem:[#allocation22_spill] sm:$0xff]  ;;  %v970_v44 = vld [vmem:[#allocation8 + $0x10] sm:$0xff] }
 0x166   :  { %726 = vmatprep.subr.mxu1 %v3114_v4  ;;  %1776 = vmatprep.subr.mxu0 %v978_v11 }
 0x167   :  { %727 = vmatpush2.msra.mxu1 %v660_v54  ;;  %1777 = vmatpush3.msra.mxu0 %v978_v11  ;;  %v3127_v54 = vld [vmem:[#allocation18_spill] sm:$0xff]  ;;  %v3136_v11 = vld [vmem:[#allocation65_spill] sm:$0xff] }
 0x168   :  { %728 = vmatprep.subr.mxu1 %v3114_v4  ;;  %1778 = vmatprep.subr.mxu0 %v977_v39 }
 0x169   :  { %729 = vmatpush2.msra.mxu1 %v659_v22  ;;  %1779 = vmatpush3.msra.mxu0 %v977_v39  ;;  %v3129_v22 = vld [vmem:[#allocation20_spill] sm:$0xff] }
 0x16a   :  { %730 = vmatprep.subr.mxu1 %v3114_v4  ;;  %1780 = vmatprep.subr.mxu0 %v976_v62  ;;  %v969_v39 = vld [vmem:[#allocation8 + $0x8] sm:$0xff] }
 0x16b   :  { %731 = vmatpush2.msra.mxu1 %v658_v15  ;;  %1781 = vmatpush3.msra.mxu0 %v976_v62  ;;  %v3130_v15 = vld [vmem:[#allocation19_spill] sm:$0xff]  ;;  %v3137_v62 = vld [vmem:[#allocation64_spill] sm:$0xff] }
 0x16c   :  { %732 = vmatprep.subr.mxu1 %v3114_v4  ;;  %1782 = vmatprep.subr.mxu0 %v975_v38 }
 0x16d   :  { %733 = vmatpush2.msra.mxu1 %v657_v32  ;;  %1783 = vmatpush3.msra.mxu0 %v975_v38  ;;  %v3131_v32 = vld [vmem:[#allocation16_spill] sm:$0xff]  ;;  %v968_v38 = vld [vmem:[#allocation8] sm:$0xff] }
 0x16e   :  { %734 = vmatprep.subr.mxu1 %v3114_v4  ;;  %1784 = vmatprep.subr.mxu0 %v974_v63 }
 0x16f   :  { %735 = vmatpush2.msra.mxu1 %v656_v5  ;;  %1785 = vmatpush3.msra.mxu0 %v974_v63  ;;  %v3134_v5 = vld [vmem:[#allocation67_spill] sm:$0xff] }
 0x170   :  { %737 = vmatmul.mubr.f32.vlgmr.msra.gmra.mxu1 %v2181_v24  ;;  %1786 = vmatprep.subr.mxu0 %v973_v8  ;;  %v3138_v63 = vld [vmem:[#allocation63_spill] sm:$0xff] }
 0x171   :  { %741 = vmatprep.mubr.f32.mxu1 %v2177_v21  ;;  %1787 = vmatpush3.msra.mxu0 %v973_v8  ;;  %v3139_v8 = vld [vmem:[#allocation62_spill] sm:$0xff] }
 0x172   :  { %1788 = vmatprep.subr.mxu0 %v972_v43 }
 0x173   :  { %1789 = vmatpush3.msra.mxu0 %v972_v43  ;;  %v3140_v43 = vld [vmem:[#allocation61_spill] sm:$0xff] }
 0x174   :  { %742 = vmatmul.mubr.f32.gmra.mxu1 %v2175_v20  ;;  %1790 = vmatprep.subr.mxu0 %v971_v55 }
 0x175   :  { %746 = vmatprep.mubr.f32.mxu1 %v2171_v7  ;;  %1791 = vmatpush3.msra.mxu0 %v971_v55  ;;  %v3141_v55 = vld [vmem:[#allocation60_spill] sm:$0xff] }
 0x176   :  { %1792 = vmatprep.subr.mxu0 %v970_v44 }
 0x177   :  { %1793 = vmatpush3.msra.mxu0 %v970_v44  ;;  %v3143_v44 = vld [vmem:[#allocation58_spill] sm:$0xff] }
 0x178   :  { %747 = vmatmul.mubr.f32.gmra.mxu1 %v2169_v6  ;;  %1794 = vmatprep.subr.mxu0 %v969_v39 }
 0x179   :  { %751 = vmatprep.mubr.f32.mxu1 %v2165_v3  ;;  %1795 = vmatpush3.msra.mxu0 %v969_v39  ;;  %v3145_v39 = vld [vmem:[#allocation56_spill] sm:$0xff] }
 0x17a   :  { %1796 = vmatprep.subr.mxu0 %v968_v38 }
 0x17b   :  { %1797 = vmatpush3.msra.mxu0 %v968_v38  ;;  %v3148_v38 = vld [vmem:[#allocation53_spill] sm:$0xff] }
 0x17c   :  { %752 = vmatmul.mubr.f32.gmra.mxu1 %v2163_v2  ;;  %1241 = vmatprep.subr.mxu0 %v3114_v4 }
 0x17d   :  { %756 = vmatprep.mubr.f32.mxu1 %v2159_v61 }
 0x180   :  { %757 = vmatmul.mubr.f32.gmra.mxu1 %v2157_v60 }
 0x181   :  { %761 = vmatprep.mubr.f32.mxu1 %v2153_v57 }
 0x184   :  { %762 = vmatmul.mubr.f32.gmra.mxu1 %v2151_v56 }
 0x185   :  { %766 = vmatprep.mubr.f32.mxu1 %v2147_v51 }
 0x188   :  { %767 = vmatmul.mubr.f32.gmra.mxu1 %v2145_v50 }
 0x189   :  { %771 = vmatprep.mubr.f32.mxu1 %v2141_v47 }
 0x18c   :  { %772 = vmatmul.mubr.f32.gmra.mxu1 %v2139_v46 }
 0x18d   :  { %776 = vmatprep.mubr.f32.mxu1 %v2135_v41 }
 0x190   :  { %777 = vmatmul.mubr.f32.gmra.mxu1 %v2133_v40 }
 0x191   :  { %781 = vmatprep.mubr.f32.mxu1 %v2129_v37 }
 0x194   :  { %782 = vmatmul.mubr.f32.gmra.mxu1 %v2127_v36 }
 0x195   :  { %786 = vmatprep.mubr.f32.mxu1 %v2123_v31 }
 0x198   :  { %787 = vmatmul.mubr.f32.gmra.mxu1 %v2121_v30 }
 0x199   :  { %791 = vmatprep.mubr.f32.mxu1 %v2117_v27 }
 0x19c   :  { %792 = vmatmul.mubr.f32.gmra.mxu1 %v3124_v33 }
 0x19d   :  { %796 = vmatprep.mubr.f32.mxu1 %v3125_v48 }
 0x1a0   :  { %797 = vmatmul.mubr.f32.gmra.mxu1 %v3126_v28 }
 0x1a1   :  { %801 = vmatprep.mubr.f32.mxu1 %v3127_v54 }
 0x1a4   :  { %802 = vmatmul.mubr.f32.gmra.mxu1 %v3128_v19 }
 0x1a5   :  { %806 = vmatprep.mubr.f32.mxu1 %v3129_v22 }
 0x1a8   :  { %807 = vmatmul.mubr.f32.gmra.mxu1 %v3130_v15 }
 0x1a9   :  { %811 = vmatprep.mubr.f32.mxu1 %v3131_v32 }
 0x1ac   :  { %812 = vmatmul.mubr.f32.gmra.mxu1 %v3132_v12 }
 0x1ad   :  { %816 = vmatprep.mubr.f32.mxu1 %v3133_v25 }
 0x1b0   :  { %817 = vmatmul.mubr.f32.gmra.mxu1 %v3134_v5  ;;  %v3150_v5 = vld [vmem:[#allocation51_spill] sm:$0xff] }
 0x1b1   :  { %821 = vmatprep.mubr.f32.mxu1 %v3135_v16  ;;  %v3146_v16 = vld [vmem:[#allocation55_spill] sm:$0xff] }
 0x1b4   :  { %822 = vmatmul.mubr.f32.gmra.mxu1 %v3136_v11  ;;  %v3142_v11 = vld [vmem:[#allocation59_spill] sm:$0xff] }
 0x1b5   :  { %826 = vmatprep.mubr.f32.mxu1 %v3137_v62  ;;  %v3144_v62 = vld [vmem:[#allocation57_spill] sm:$0xff] }
 0x1b8   :  { %827 = vmatmul.mubr.f32.gmra.mxu1 %v3138_v63  ;;  %v3147_v63 = vld [vmem:[#allocation54_spill] sm:$0xff] }
 0x1b9   :  { %831 = vmatprep.mubr.f32.mxu1 %v3139_v8  ;;  %v3149_v8 = vld [vmem:[#allocation52_spill] sm:$0xff] }
 0x1bc   :  { %832 = vmatmul.mubr.f32.gmra.mxu1 %v3140_v43  ;;  %v3151_v43 = vld [vmem:[#allocation50_spill] sm:$0xff] }
 0x1bd   :  { %836 = vmatprep.mubr.f32.mxu1 %v3141_v55  ;;  %v3152_v55 = vld [vmem:[#allocation49_spill] sm:$0xff] }
 0x1c0   :  { %837 = vmatmul.mubr.f32.gmra.mxu1 %v3142_v11  ;;  %v3153_v11 = vld [vmem:[#allocation48_spill] sm:$0xff] }
 0x1c1   :  { %841 = vmatprep.mubr.f32.mxu1 %v3143_v44  ;;  %v3154_v44 = vld [vmem:[#allocation47_spill] sm:$0xff] }
 0x1c4   :  { %842 = vmatmul.mubr.f32.gmra.mxu1 %v3144_v62  ;;  %v3155_v62 = vld [vmem:[#allocation46_spill] sm:$0xff] }
 0x1c5   :  { %846 = vmatprep.mubr.f32.mxu1 %v3145_v39  ;;  %v3156_v39 = vld [vmem:[#allocation45_spill] sm:$0xff] }
 0x1c8   :  { %847 = vmatmul.mubr.f32.gmra.mxu1 %v3146_v16  ;;  %v3157_v16 = vld [vmem:[#allocation44_spill] sm:$0xff] }
 0x1c9   :  { %851 = vmatprep.mubr.f32.mxu1 %v3147_v63  ;;  %v3158_v63 = vld [vmem:[#allocation43_spill] sm:$0xff] }
 0x1cc   :  { %852 = vmatmul.mubr.f32.gmra.mxu1 %v3148_v38  ;;  %v3159_v38 = vld [vmem:[#allocation42_spill] sm:$0xff] }
 0x1cd   :  { %856 = vmatprep.mubr.f32.mxu1 %v3149_v8  ;;  %v3160_v8 = vld [vmem:[#allocation41_spill] sm:$0xff] }
 0x1d0   :  { %857 = vmatmul.mubr.f32.gmra.mxu1 %v3150_v5  ;;  %v3161_v5 = vld [vmem:[#allocation40_spill] sm:$0xff] }
 0x1d1   :  { %861 = vmatprep.mubr.f32.mxu1 %v3151_v43  ;;  %v3162_v43 = vld [vmem:[#allocation39_spill] sm:$0xff] }
 0x1d4   :  { %862 = vmatmul.mubr.f32.gmra.mxu1 %v3152_v55  ;;  %v3163_v55 = vld [vmem:[#allocation38_spill] sm:$0xff] }
 0x1d5   :  { %866 = vmatprep.mubr.f32.mxu1 %v3153_v11  ;;  %v3164_v11 = vld [vmem:[#allocation37_spill] sm:$0xff] }
 0x1d8   :  { %867 = vmatmul.mubr.f32.gmra.mxu1 %v3154_v44 }
 0x1d9   :  { %871 = vmatprep.mubr.f32.mxu1 %v3155_v62 }
 0x1dc   :  { %872 = vmatmul.mubr.f32.gmra.mxu1 %v3156_v39  ;;  %v2655_v39 = vld [vmem:[%s2932_s3] ss:$0 sm:$0xff] }
 0x1dd   :  { %876 = vmatprep.mubr.f32.mxu1 %v3157_v16 }
 0x1e0   :  { %877 = vmatmul.mubr.f32.gmra.mxu1 %v3158_v63 }
 0x1e1   :  { %881 = vmatprep.mubr.f32.mxu1 %v3159_v38 }
 0x1e4   :  { %882 = vmatmul.mubr.f32.gmra.mxu1 %v3160_v8 }
 0x1e5   :  { %886 = vmatprep.mubr.f32.mxu1 %v3161_v5 }
 0x1e8   :  { %887 = vmatmul.mubr.f32.gmra.mxu1 %v3162_v43 }
 0x1e9   :  { %891 = vmatprep.mubr.f32.mxu1 %v3163_v55 }
 0x1ec   :  { %892 = vmatmul.mubr.f32.gmra.mxu1 %v3164_v11 }
 0x230   :  { %v738_v44 = vpop.f32.mrf.mxu1 }
 0x231   :  { %v897_v63 = vmul.f32 %v738_v44, %v2476_v26 }
 0x232   :  { %v740_v16 = vpop.f32.mrf.mxu1 }
 0x233   :  { %v936_v38 = vadd.f32 %v2655_v39, %v897_v63 }
 0x234   :  { %v743_v8 = vpop.f32.mrf.mxu1 }
 0x235   :  { %v898_v5 = vmul.f32 %v743_v8, %v2466_v45  ;;  %1798 = vmatprep.mubr.f32.mxu0 %v936_v38 }
 0x236   :  { %v745_v43 = vpop.f32.mrf.mxu1 }
 0x237   :  { %v937_v55 = vadd.f32 %v2655_v39, %v898_v5 }
 0x238   :  { %v748_v62 = vpop.f32.mrf.mxu1 }
 0x239   :  { %v899_v11 = vmul.f32 %v748_v62, %v2457_v58  ;;  %1799 = vmatmul.mubr.f32.vlgmr.msra.gmra.mxu0 %v937_v55  ;;  %v3165_v62 = vld [vmem:[#allocation79_spill] sm:$0xff] }
 0x23a   :  { %v750_v25 = vpop.f32.mrf.mxu1 }
 0x23b   :  { %v938_v12 = vadd.f32 %v2655_v39, %v899_v11 }
 0x23c   :  { %v753_v32 = vpop.f32.mrf.mxu1 }
 0x23d   :  { %v900_v44 = vmul.f32 %v753_v32, %v2446_v13  ;;  %1801 = vmatprep.mubr.f32.mxu0 %v938_v12  ;;  %v3166_v32 = vld [vmem:[#allocation78_spill] sm:$0xff] }
 0x23e   :  { %v755_v16 = vpop.f32.mrf.mxu1 }
 0x23f   :  { %v939_v63 = vadd.f32 %v2655_v39, %v900_v44 }
 0x240   :  { %v758_v15 = vpop.f32.mrf.mxu1 }
 0x241   :  { %v901_v8 = vmul.f32 %v758_v15, %v2434_v14  ;;  %1802 = vmatmul.mubr.f32.gmra.mxu0 %v939_v63  ;;  %v3167_v15 = vld [vmem:[#allocation77_spill] sm:$0xff] }
 0x242   :  { %v760_v43 = vpop.f32.mrf.mxu1 }
 0x243   :  { %v940_v5 = vadd.f32 %v2655_v39, %v901_v8 }
 0x244   :  { %v763_v38 = vpop.f32.mrf.mxu1 }
 0x245   :  { %v902_v55 = vmul.f32 %v763_v38, %v3165_v62  ;;  %1804 = vmatprep.mubr.f32.mxu0 %v940_v5  ;;  %v3168_v38 = vld [vmem:[#allocation76_spill] sm:$0xff] }
 0x246   :  { %v765_v25 = vpop.f32.mrf.mxu1 }
 0x247   :  { %v941_v11 = vadd.f32 %v2655_v39, %v902_v55 }
 0x248   :  { %v768_v22 = vpop.f32.mrf.mxu1 }
 0x249   :  { %v903_v12 = vmul.f32 %v768_v22, %v3166_v32  ;;  %1805 = vmatmul.mubr.f32.gmra.mxu0 %v941_v11  ;;  %v3169_v22 = vld [vmem:[#allocation75_spill] sm:$0xff] }
 0x24a   :  { %v770_v16 = vpop.f32.mrf.mxu1 }
 0x24b   :  { %v942_v44 = vadd.f32 %v2655_v39, %v903_v12 }
 0x24c   :  { %v773_v19 = vpop.f32.mrf.mxu1 }
 0x24d   :  { %v904_v63 = vmul.f32 %v773_v19, %v3167_v15  ;;  %1807 = vmatprep.mubr.f32.mxu0 %v942_v44  ;;  %v3170_v19 = vld [vmem:[#allocation74_spill] sm:$0xff] }
 0x24e   :  { %v775_v43 = vpop.f32.mrf.mxu1 }
 0x24f   :  { %v943_v8 = vadd.f32 %v2655_v39, %v904_v63 }
 0x250   :  { %v778_v54 = vpop.f32.mrf.mxu1 }
 0x251   :  { %v905_v5 = vmul.f32 %v778_v54, %v3168_v38  ;;  %1808 = vmatmul.mubr.f32.gmra.mxu0 %v943_v8  ;;  %v3171_v54 = vld [vmem:[#allocation73_spill] sm:$0xff] }
 0x252   :  { %v780_v25 = vpop.f32.mrf.mxu1 }
 0x253   :  { %v944_v55 = vadd.f32 %v2655_v39, %v905_v5 }
 0x254   :  { %v783_v28 = vpop.f32.mrf.mxu1 }
 0x255   :  { %v906_v11 = vmul.f32 %v783_v28, %v3169_v22  ;;  %1810 = vmatprep.mubr.f32.mxu0 %v944_v55  ;;  %v3172_v28 = vld [vmem:[#allocation72_spill] sm:$0xff] }
 0x256   :  { %v785_v16 = vpop.f32.mrf.mxu1 }
 0x257   :  { %v945_v12 = vadd.f32 %v2655_v39, %v906_v11 }
 0x258   :  { %v788_v48 = vpop.f32.mrf.mxu1 }
 0x259   :  { %v907_v44 = vmul.f32 %v788_v48, %v3170_v19  ;;  %1811 = vmatmul.mubr.f32.gmra.mxu0 %v945_v12  ;;  %v3173_v48 = vld [vmem:[#allocation71_spill] sm:$0xff] }
 0x25a   :  { %v790_v43 = vpop.f32.mrf.mxu1 }
 0x25b   :  { %v946_v63 = vadd.f32 %v2655_v39, %v907_v44 }
 0x25c   :  { %v793_v33 = vpop.f32.mrf.mxu1 }
 0x25d   :  { %v908_v8 = vmul.f32 %v793_v33, %v3171_v54  ;;  %1813 = vmatprep.mubr.f32.mxu0 %v946_v63  ;;  %v3174_v33 = vld [vmem:[#allocation70_spill] sm:$0xff] }
 0x25e   :  { %v795_v25 = vpop.f32.mrf.mxu1 }
 0x25f   :  { %v947_v5 = vadd.f32 %v2655_v39, %v908_v8 }
 0x260   :  { %v798_v27 = vpop.f32.mrf.mxu1 }
 0x261   :  { %v909_v55 = vmul.f32 %v798_v27, %v3172_v28  ;;  %1814 = vmatmul.mubr.f32.gmra.mxu0 %v947_v5  ;;  %v3175_v27 = vld [vmem:[#allocation69_spill] sm:$0xff] }
 0x262   :  { %v800_v16 = vpop.f32.mrf.mxu1 }
 0x263   :  { %v948_v11 = vadd.f32 %v2655_v39, %v909_v55 }
 0x264   :  { %v803_v30 = vpop.f32.mrf.mxu1 }
 0x265   :  { %v910_v12 = vmul.f32 %v803_v30, %v3173_v48  ;;  %1816 = vmatprep.mubr.f32.mxu0 %v948_v11 }
 0x266   :  { %v805_v43 = vpop.f32.mrf.mxu1 }
 0x267   :  { %v949_v44 = vadd.f32 %v2655_v39, %v910_v12 }
 0x268   :  { %v808_v31 = vpop.f32.mrf.mxu1 }
 0x269   :  { %v911_v63 = vmul.f32 %v808_v31, %v3174_v33  ;;  %1817 = vmatmul.mubr.f32.gmra.mxu0 %v949_v44 }
 0x26a   :  { %v810_v25 = vpop.f32.mrf.mxu1 }
 0x26b   :  { %v950_v8 = vadd.f32 %v2655_v39, %v911_v63 }
 0x26c   :  { %v813_v36 = vpop.f32.mrf.mxu1 }
 0x26d   :  { %v912_v5 = vmul.f32 %v813_v36, %v3175_v27  ;;  %1819 = vmatprep.mubr.f32.mxu0 %v950_v8 }
 0x26e   :  { %v815_v16 = vpop.f32.mrf.mxu1 }
 0x26f   :  { %v951_v55 = vadd.f32 %v2655_v39, %v912_v5 }
 0x270   :  { %v818_v37 = vpop.f32.mrf.mxu1 }
 0x271   :  { %v913_v30 = vmul.f32 %v818_v37, %v2579_v49  ;;  %1820 = vmatmul.mubr.f32.gmra.mxu0 %v951_v55 }
 0x272   :  { %v820_v11 = vpop.f32.mrf.mxu1 }
 0x273   :  { %v952_v12 = vadd.f32 %v2655_v39, %v913_v30 }
 0x274   :  { %v823_v43 = vpop.f32.mrf.mxu1 }
 0x275   :  { %v914_v31 = vmul.f32 %v823_v43, %v2574_v53  ;;  %1822 = vmatprep.mubr.f32.mxu0 %v952_v12 }
 0x276   :  { %v825_v44 = vpop.f32.mrf.mxu1 }
 0x277   :  { %v953_v63 = vadd.f32 %v2655_v39, %v914_v31 }
 0x278   :  { %v828_v25 = vpop.f32.mrf.mxu1 }
 0x279   :  { %v915_v36 = vmul.f32 %v828_v25, %v2569_v9  ;;  %1823 = vmatmul.mubr.f32.gmra.mxu0 %v953_v63 }
 0x27a   :  { %v830_v8 = vpop.f32.mrf.mxu1 }
 0x27b   :  { %v954_v5 = vadd.f32 %v2655_v39, %v915_v36 }
 0x27c   :  { %v833_v16 = vpop.f32.mrf.mxu1 }
 0x27d   :  { %v916_v37 = vmul.f32 %v833_v16, %v2564_v29  ;;  %1825 = vmatprep.mubr.f32.mxu0 %v954_v5 }
 0x27e   :  { %v835_v55 = vpop.f32.mrf.mxu1 }
 0x27f   :  { %v955_v30 = vadd.f32 %v2655_v39, %v916_v37 }
 0x280   :  { %v838_v11 = vpop.f32.mrf.mxu1 }
 0x281   :  { %v917_v12 = vmul.f32 %v838_v11, %v2558_v1  ;;  %1826 = vmatmul.mubr.f32.gmra.mxu0 %v955_v30 }
 0x282   :  { %v840_v43 = vpop.f32.mrf.mxu1 }
 0x283   :  { %v956_v31 = vadd.f32 %v2655_v39, %v917_v12 }
 0x284   :  { %v843_v44 = vpop.f32.mrf.mxu1 }
 0x285   :  { %v918_v63 = vmul.f32 %v843_v44, %v2552_v42  ;;  %1828 = vmatprep.mubr.f32.mxu0 %v956_v31 }
 0x286   :  { %v845_v25 = vpop.f32.mrf.mxu1 }
 0x287   :  { %v957_v36 = vadd.f32 %v2655_v39, %v918_v63 }
 0x288   :  { %v848_v8 = vpop.f32.mrf.mxu1 }
 0x289   :  { %v919_v5 = vmul.f32 %v848_v8, %v2546_v34  ;;  %1829 = vmatmul.mubr.f32.gmra.mxu0 %v957_v36 }
 0x28a   :  { %v850_v16 = vpop.f32.mrf.mxu1 }
 0x28b   :  { %v958_v37 = vadd.f32 %v2655_v39, %v919_v5 }
 0x28c   :  { %v853_v55 = vpop.f32.mrf.mxu1 }
 0x28d   :  { %v920_v30 = vmul.f32 %v853_v55, %v2540_v17  ;;  %1831 = vmatprep.mubr.f32.mxu0 %v958_v37 }
 0x28e   :  { %v855_v11 = vpop.f32.mrf.mxu1 }
 0x28f   :  { %v959_v12 = vadd.f32 %v2655_v39, %v920_v30 }
 0x290   :  { %v858_v43 = vpop.f32.mrf.mxu1 }
 0x291   :  { %v921_v31 = vmul.f32 %v858_v43, %v2534_v35  ;;  %1832 = vmatmul.mubr.f32.gmra.mxu0 %v959_v12 }
 0x292   :  { %v860_v44 = vpop.f32.mrf.mxu1 }
 0x293   :  { %v960_v63 = vadd.f32 %v2655_v39, %v921_v31 }
 0x294   :  { %v863_v25 = vpop.f32.mrf.mxu1 }
 0x295   :  { %v922_v36 = vmul.f32 %v863_v25, %v2528_v23  ;;  %1834 = vmatprep.mubr.f32.mxu0 %v960_v63 }
 0x296   :  { %v865_v8 = vpop.f32.mrf.mxu1 }
 0x297   :  { %v961_v5 = vadd.f32 %v2655_v39, %v922_v36 }
 0x298   :  { %v868_v16 = vpop.f32.mrf.mxu1 }
 0x299   :  { %v923_v37 = vmul.f32 %v868_v16, %v2521_v59  ;;  %1835 = vmatmul.mubr.f32.gmra.mxu0 %v961_v5 }
 0x29a   :  { %v870_v55 = vpop.f32.mrf.mxu1 }
 0x29b   :  { %v962_v30 = vadd.f32 %v2655_v39, %v923_v37 }
 0x29c   :  { %v873_v11 = vpop.f32.mrf.mxu1 }
 0x29d   :  { %v924_v12 = vmul.f32 %v873_v11, %v2515_v52  ;;  %1837 = vmatprep.mubr.f32.mxu0 %v962_v30 }
 0x29e   :  { %v875_v43 = vpop.f32.mrf.mxu1 }
 0x29f   :  { %v963_v31 = vadd.f32 %v2655_v39, %v924_v12 }
 0x2a0   :  { %v878_v44 = vpop.f32.mrf.mxu1 }
 0x2a1   :  { %v925_v63 = vmul.f32 %v878_v44, %v2513_v10  ;;  %1838 = vmatmul.mubr.f32.gmra.mxu0 %v963_v31  ;;  %v3176_v44 = vld [vmem:[#allocation80_spill] sm:$0xff] }
 0x2a2   :  { %v880_v25 = vpop.f32.mrf.mxu1 }
 0x2a3   :  { %v964_v36 = vadd.f32 %v2655_v39, %v925_v63 }
 0x2a4   :  { %v883_v8 = vpop.f32.mrf.mxu1 }
 0x2a5   :  { %v926_v5 = vmul.f32 %v883_v8, %v2507_v0  ;;  %1840 = vmatprep.mubr.f32.mxu0 %v964_v36  ;;  %v3177_v8 = vld [vmem:[#allocation36_spill] sm:$0xff] }
 0x2a6   :  { %v885_v16 = vpop.f32.mrf.mxu1 }
 0x2a7   :  { %v965_v37 = vadd.f32 %v2655_v39, %v926_v5 }
 0x2a8   :  { %v888_v55 = vpop.f32.mrf.mxu1 }
 0x2a9   :  { %v927_v30 = vmul.f32 %v888_v55, %v2498_v18  ;;  %1841 = vmatmul.mubr.f32.gmra.mxu0 %v965_v37 }
 0x2aa   :  { %v890_v11 = vpop.f32.mrf.mxu1 }
 0x2ab   :  { %v966_v12 = vadd.f32 %v2655_v39, %v927_v30 }
 0x2ac   :  { %v893_v43 = vpop.f32.mrf.mxu1 }
 0x2ad   :  { %v928_v31 = vmul.f32 %v893_v43, %v3176_v44  ;;  %1843 = vmatprep.mubr.f32.mxu0 %v966_v12 }
 0x2ae   :  { %v895_v25 = vpop.f32.mrf.mxu1 }
 0x2af   :  { %v967_v63 = vadd.f32 %v2655_v39, %v928_v31 }
 0x2b1   :  { %1844 = vmatmul.mubr.f32.gmra.mxu0 %v967_v63 }
 0x2b2   :  { %1305 = vmatprep.mubr.f32.mxu0 %v3177_v8 }
 0x2f9   :  { %v1800_v36 = vpop.f32.mrf.mxu0 }
 0x2fb   :  { %v1050_v16 = vpop.f32.mrf.mxu0 }
 0x301   :  { %v1803_v5 = vpop.f32.mrf.mxu0 }
 0x303   :  { %v1060_v40 = vpop.f32.mrf.mxu0 }
 0x309   :  { %v1806_v41 = vpop.f32.mrf.mxu0 }
 0x30b   :  { %v1070_v55 = vpop.f32.mrf.mxu0 }
 0x311   :  { %v1809_v37 = vpop.f32.mrf.mxu0 }
 0x313   :  { %v1080_v11 = vpop.f32.mrf.mxu0 }
 0x319   :  { %v1812_v46 = vpop.f32.mrf.mxu0 }
 0x31b   :  { %v1090_v30 = vpop.f32.mrf.mxu0 }
 0x321   :  { %v1815_v47 = vpop.f32.mrf.mxu0 }
 0x322   :  { %v1220_v56 = vmul.f32 %v1815_v47, %v3171_v54  ;;  %v1216_v47 = vmul.f32 %v1809_v37, %v3167_v15  ;;  %v1212_v37 = vmul.f32 %v1803_v5, %v2446_v13 }
 0x323   :  { %v1100_v50 = vpop.f32.mrf.mxu0 }
 0x329   :  { %v1818_v43 = vpop.f32.mrf.mxu0 }
 0x32a   :  { %v1222_v8 = vmul.f32 %v1818_v43, %v3173_v48  ;;  %v1218_v43 = vmul.f32 %v1812_v46, %v3169_v22  ;;  %v1214_v46 = vmul.f32 %v1806_v41, %v3165_v62 }
 0x32b   :  { %v1110_v12 = vpop.f32.mrf.mxu0 }
 0x32c   :  { %v1221_v51 = vmul.f32 %v1110_v12, %v3172_v28  ;;  %v1217_v12 = vmul.f32 %v1090_v30, %v3168_v38 }
 0x331   :  { %v1821_v25 = vpop.f32.mrf.mxu0 }
 0x332   :  { %v1224_v39 = vmul.f32 %v1821_v25, %v3175_v27  ;;  %v1219_v25 = vmul.f32 %v1100_v50, %v3170_v19  ;;  %v1215_v50 = vmul.f32 %v1080_v11, %v3166_v32  ;;  %v1211_v11 = vmul.f32 %v1060_v40, %v2457_v58 }
 0x333   :  { %v1120_v31 = vpop.f32.mrf.mxu0 }
 0x334   :  { %v1223_v63 = vmul.f32 %v1120_v31, %v3174_v33  ;;  %1242 = vmatpush1.msra.mxu0 %v1224_v39  ;;  %v1210_v39 = vmul.f32 %v1800_v36, %v2466_v45 }
 0x335   :  { %1243 = vmatprep.subr.mxu0 %v3114_v4 }
 0x336   :  { %1244 = vmatpush1.msra.mxu0 %v1223_v63 }
 0x337   :  { %1245 = vmatprep.subr.mxu0 %v3114_v4 }
 0x338   :  { %1246 = vmatpush1.msra.mxu0 %v1222_v8 }
 0x339   :  { %1247 = vmatprep.subr.mxu0 %v3114_v4 }
 0x33a   :  { %1248 = vmatpush1.msra.mxu0 %v1221_v51  ;;  %v2742_v51 = vpop.f32.mrf.mxu0 }
 0x33b   :  { %1249 = vmatprep.subr.mxu0 %v3114_v4 }
 0x33c   :  { %1250 = vmatpush1.msra.mxu0 %v1220_v56  ;;  %v1213_v56 = vmul.f32 %v1070_v55, %v2434_v14  ;;  %v2748_v30 = vpop.f32.mrf.mxu0  ;;  %v1209_v55 = vmul.f32 %v1050_v16, %v2476_v26 }
 0x33d   :  { %1251 = vmatprep.subr.mxu0 %v3114_v4 }
 0x33e   :  { %1252 = vmatpush1.msra.mxu0 %v1219_v25 }
 0x33f   :  { %1253 = vmatprep.subr.mxu0 %v3114_v4 }
 0x340   :  { %1254 = vmatpush1.msra.mxu0 %v1218_v43 }
 0x341   :  { %1255 = vmatprep.subr.mxu0 %v3114_v4  ;;  %v1827_v41 = vpop.f32.mrf.mxu0 }
 0x342   :  { %1256 = vmatpush1.msra.mxu0 %v1217_v12 }
 0x343   :  { %1257 = vmatprep.subr.mxu0 %v3114_v4  ;;  %v1140_v5 = vpop.f32.mrf.mxu0 }
 0x344   :  { %1258 = vmatpush1.msra.mxu0 %v1216_v47 }
 0x345   :  { %1259 = vmatprep.subr.mxu0 %v3114_v4 }
 0x346   :  { %1260 = vmatpush1.msra.mxu0 %v1215_v50 }
 0x347   :  { %1261 = vmatprep.subr.mxu0 %v3114_v4 }
 0x348   :  { %1262 = vmatpush1.msra.mxu0 %v1214_v46 }
 0x349   :  { %1263 = vmatprep.subr.mxu0 %v3114_v4  ;;  %v1830_v31 = vpop.f32.mrf.mxu0 }
 0x34a   :  { %1264 = vmatpush1.msra.mxu0 %v1213_v56 }
 0x34b   :  { %1265 = vmatprep.subr.mxu0 %v3114_v4  ;;  %v1150_v40 = vpop.f32.mrf.mxu0 }
 0x34c   :  { %1266 = vmatpush1.msra.mxu0 %v1212_v37 }
 0x34d   :  { %1267 = vmatprep.subr.mxu0 %v3114_v4 }
 0x34e   :  { %1268 = vmatpush1.msra.mxu0 %v1211_v11 }
 0x34f   :  { %1269 = vmatprep.subr.mxu0 %v3114_v4 }
 0x350   :  { %1270 = vmatpush1.msra.mxu0 %v1210_v39 }
 0x351   :  { %1271 = vmatprep.subr.mxu0 %v3114_v4  ;;  %v1833_v63 = vpop.f32.mrf.mxu0 }
 0x352   :  { %1272 = vmatpush1.msra.mxu0 %v1209_v55 }
 0x353   :  { %1273 = vmatprep.subr.mxu0 %v3114_v4  ;;  %v1160_v8 = vpop.f32.mrf.mxu0 }
 0x359   :  { %v1836_v25 = vpop.f32.mrf.mxu0 }
 0x35b   :  { %v1170_v43 = vpop.f32.mrf.mxu0 }
 0x361   :  { %v1839_v12 = vpop.f32.mrf.mxu0 }
 0x362   :  { %v1236_v55 = vmul.f32 %v1839_v12, %v2515_v52  ;;  %v1232_v12 = vmul.f32 %v1833_v63, %v2540_v17  ;;  %v1228_v63 = vmul.f32 %v1827_v41, %v2564_v29  ;;  %v3191_v41 = vld [vmem:[#allocation22_spill] sm:$0xff] }
 0x363   :  { %v1180_v36 = vpop.f32.mrf.mxu0 }
 0x369   :  { %v1842_v47 = vpop.f32.mrf.mxu0 }
 0x36a   :  { %v1238_v11 = vmul.f32 %v1842_v47, %v2507_v0  ;;  %v1234_v47 = vmul.f32 %v1836_v25, %v2528_v23  ;;  %v1230_v25 = vmul.f32 %v1830_v31, %v2552_v42  ;;  %v1226_v31 = vmul.f32 %v2742_v51, %v2574_v53  ;;  %v3189_v51 = vld [vmem:[#allocation24_spill] sm:$0xff] }
 0x36b   :  { %v1190_v50 = vpop.f32.mrf.mxu0 }
 0x36c   :  { %v1237_v39 = vmul.f32 %v1190_v50, %v2513_v10  ;;  %v1233_v50 = vmul.f32 %v1170_v43, %v2534_v35  ;;  %v1229_v43 = vmul.f32 %v1150_v40, %v2558_v1  ;;  %v1225_v40 = vmul.f32 %v2748_v30, %v2579_v49  ;;  %v3190_v30 = vld [vmem:[#allocation23_spill] sm:$0xff] }
 0x371   :  { %v1845_v46 = vpop.f32.mrf.mxu0 }
 0x372   :  { %v1240_v16 = vmul.f32 %v1845_v46, %v3176_v44  ;;  %v1235_v46 = vmul.f32 %v1180_v36, %v2521_v59  ;;  %v1231_v36 = vmul.f32 %v1160_v8, %v2546_v34  ;;  %v1227_v8 = vmul.f32 %v1140_v5, %v2569_v9  ;;  %v3192_v5 = vld [vmem:[#allocation21_spill] sm:$0xff] }
 0x373   :  { %v1200_v56 = vpop.f32.mrf.mxu0 }
 0x374   :  { %v1239_v37 = vmul.f32 %v1200_v56, %v2498_v18  ;;  %1274 = vmatpush2.msra.mxu0 %v1240_v16  ;;  %v3193_v16 = vld [vmem:[#allocation18_spill] sm:$0xff]  ;;  %v3194_v56 = vld [vmem:[#allocation17_spill] sm:$0xff] }
 0x375   :  { %1275 = vmatprep.subr.mxu0 %v3114_v4 }
 0x376   :  { %1276 = vmatpush2.msra.mxu0 %v1239_v37  ;;  %v3195_v37 = vld [vmem:[#allocation20_spill] sm:$0xff] }
 0x377   :  { %1277 = vmatprep.subr.mxu0 %v3114_v4 }
 0x378   :  { %1278 = vmatpush2.msra.mxu0 %v1238_v11  ;;  %v3196_v11 = vld [vmem:[#allocation19_spill] sm:$0xff] }
 0x379   :  { %1279 = vmatprep.subr.mxu0 %v3114_v4 }
 0x37a   :  { %1280 = vmatpush2.msra.mxu0 %v1237_v39  ;;  %v3197_v39 = vld [vmem:[#allocation16_spill] sm:$0xff] }
 0x37b   :  { %1281 = vmatprep.subr.mxu0 %v3114_v4 }
 0x37c   :  { %1282 = vmatpush2.msra.mxu0 %v1236_v55  ;;  %v3198_v55 = vld [vmem:[#allocation15_spill] sm:$0xff] }
 0x37d   :  { %1283 = vmatprep.subr.mxu0 %v3114_v4 }
 0x37e   :  { %1284 = vmatpush2.msra.mxu0 %v1235_v46  ;;  %v3199_v46 = vld [vmem:[#allocation68_spill] sm:$0xff] }
 0x37f   :  { %1285 = vmatprep.subr.mxu0 %v3114_v4 }
 0x380   :  { %1286 = vmatpush2.msra.mxu0 %v1234_v47  ;;  %v3200_v47 = vld [vmem:[#allocation67_spill] sm:$0xff] }
 0x381   :  { %1287 = vmatprep.subr.mxu0 %v3114_v4 }
 0x382   :  { %1288 = vmatpush2.msra.mxu0 %v1233_v50  ;;  %v3201_v50 = vld [vmem:[#allocation66_spill] sm:$0xff] }
 0x383   :  { %1289 = vmatprep.subr.mxu0 %v3114_v4 }
 0x384   :  { %1290 = vmatpush2.msra.mxu0 %v1232_v12  ;;  %v3202_v12 = vld [vmem:[#allocation65_spill] sm:$0xff] }
 0x385   :  { %1291 = vmatprep.subr.mxu0 %v3114_v4 }
 0x386   :  { %1292 = vmatpush2.msra.mxu0 %v1231_v36  ;;  %v3203_v36 = vld [vmem:[#allocation64_spill] sm:$0xff] }
 0x387   :  { %1293 = vmatprep.subr.mxu0 %v3114_v4 }
 0x388   :  { %1294 = vmatpush2.msra.mxu0 %v1230_v25  ;;  %v3204_v25 = vld [vmem:[#allocation63_spill] sm:$0xff] }
 0x389   :  { %1295 = vmatprep.subr.mxu0 %v3114_v4 }
 0x38a   :  { %1296 = vmatpush2.msra.mxu0 %v1229_v43  ;;  %v3205_v43 = vld [vmem:[#allocation62_spill] sm:$0xff] }
 0x38b   :  { %1297 = vmatprep.subr.mxu0 %v3114_v4 }
 0x38c   :  { %1298 = vmatpush2.msra.mxu0 %v1228_v63  ;;  %v3206_v63 = vld [vmem:[#allocation61_spill] sm:$0xff] }
 0x38d   :  { %1299 = vmatprep.subr.mxu0 %v3114_v4 }
 0x38e   :  { %1300 = vmatpush2.msra.mxu0 %v1227_v8  ;;  %v3207_v8 = vld [vmem:[#allocation60_spill] sm:$0xff] }
 0x38f   :  { %1301 = vmatprep.subr.mxu0 %v3114_v4 }
 0x390   :  { %1302 = vmatpush2.msra.mxu0 %v1226_v31  ;;  %v3208_v31 = vld [vmem:[#allocation59_spill] sm:$0xff] }
 0x391   :  { %1303 = vmatprep.subr.mxu0 %v3114_v4  ;;  %v3178_v4 = vld [vmem:[#allocation35_spill] sm:$0xff] }
 0x392   :  { %1304 = vmatpush2.msra.mxu0 %v1225_v40  ;;  %v3209_v40 = vld [vmem:[#allocation58_spill] sm:$0xff] }
 0x393   :  { %1306 = vmatmul.mubr.f32.vlgmr.msra.gmra.mxu0 %v2181_v24  ;;  %v3179_v24 = vld [vmem:[#allocation34_spill] sm:$0xff] }
 0x394   :  { %1310 = vmatprep.mubr.f32.mxu0 %v2177_v21  ;;  %v3180_v21 = vld [vmem:[#allocation33_spill] sm:$0xff] }
 0x397   :  { %1311 = vmatmul.mubr.f32.gmra.mxu0 %v2175_v20  ;;  %v3181_v20 = vld [vmem:[#allocation32_spill] sm:$0xff] }
 0x398   :  { %1315 = vmatprep.mubr.f32.mxu0 %v2171_v7  ;;  %v3182_v7 = vld [vmem:[#allocation31_spill] sm:$0xff] }
 0x39b   :  { %1316 = vmatmul.mubr.f32.gmra.mxu0 %v2169_v6  ;;  %v3183_v6 = vld [vmem:[#allocation30_spill] sm:$0xff] }
 0x39c   :  { %1320 = vmatprep.mubr.f32.mxu0 %v2165_v3  ;;  %v3184_v3 = vld [vmem:[#allocation29_spill] sm:$0xff] }
 0x39f   :  { %1321 = vmatmul.mubr.f32.gmra.mxu0 %v2163_v2  ;;  %v3185_v2 = vld [vmem:[#allocation28_spill] sm:$0xff] }
 0x3a0   :  { %1325 = vmatprep.mubr.f32.mxu0 %v2159_v61  ;;  %v3186_v61 = vld [vmem:[#allocation27_spill] sm:$0xff] }
 0x3a3   :  { %1326 = vmatmul.mubr.f32.gmra.mxu0 %v2157_v60  ;;  %v3187_v60 = vld [vmem:[#allocation26_spill] sm:$0xff] }
 0x3a4   :  { %1330 = vmatprep.mubr.f32.mxu0 %v2153_v57  ;;  %v3188_v57 = vld [vmem:[#allocation25_spill] sm:$0xff] }
 0x3a7   :  { %1331 = vmatmul.mubr.f32.gmra.mxu0 %v3178_v4  ;;  %v3210_v4 = vld [vmem:[#allocation57_spill] sm:$0xff] }
 0x3a8   :  { %1335 = vmatprep.mubr.f32.mxu0 %v3179_v24  ;;  %v3211_v24 = vld [vmem:[#allocation56_spill] sm:$0xff] }
 0x3ab   :  { %1336 = vmatmul.mubr.f32.gmra.mxu0 %v3180_v21  ;;  %v3212_v21 = vld [vmem:[#allocation55_spill] sm:$0xff] }
 0x3ac   :  { %1340 = vmatprep.mubr.f32.mxu0 %v3181_v20  ;;  %v3213_v20 = vld [vmem:[#allocation54_spill] sm:$0xff] }
 0x3af   :  { %1341 = vmatmul.mubr.f32.gmra.mxu0 %v3182_v7  ;;  %v3214_v7 = vld [vmem:[#allocation53_spill] sm:$0xff] }
 0x3b0   :  { %1345 = vmatprep.mubr.f32.mxu0 %v3183_v6  ;;  %v3215_v6 = vld [vmem:[#allocation52_spill] sm:$0xff] }
 0x3b3   :  { %1346 = vmatmul.mubr.f32.gmra.mxu0 %v3184_v3  ;;  %v3216_v3 = vld [vmem:[#allocation51_spill] sm:$0xff] }
 0x3b4   :  { %1350 = vmatprep.mubr.f32.mxu0 %v3185_v2  ;;  %v3217_v2 = vld [vmem:[#allocation50_spill] sm:$0xff] }
 0x3b7   :  { %1351 = vmatmul.mubr.f32.gmra.mxu0 %v3186_v61  ;;  %v3218_v61 = vld [vmem:[#allocation49_spill] sm:$0xff] }
 0x3b8   :  { %1355 = vmatprep.mubr.f32.mxu0 %v3187_v60  ;;  %v3219_v60 = vld [vmem:[#allocation48_spill] sm:$0xff] }
 0x3bb   :  { %1356 = vmatmul.mubr.f32.gmra.mxu0 %v3188_v57  ;;  %v3220_v57 = vld [vmem:[#allocation47_spill] sm:$0xff] }
 0x3bc   :  { %1360 = vmatprep.mubr.f32.mxu0 %v3189_v51  ;;  %v3221_v51 = vld [vmem:[#allocation46_spill] sm:$0xff] }
 0x3bf   :  { %1361 = vmatmul.mubr.f32.gmra.mxu0 %v3190_v30  ;;  %v3222_v30 = vld [vmem:[#allocation45_spill] sm:$0xff] }
 0x3c0   :  { %1365 = vmatprep.mubr.f32.mxu0 %v3191_v41  ;;  %v3223_v41 = vld [vmem:[#allocation44_spill] sm:$0xff] }
 0x3c3   :  { %1366 = vmatmul.mubr.f32.gmra.mxu0 %v3192_v5  ;;  %v3224_v5 = vld [vmem:[#allocation43_spill] sm:$0xff] }
 0x3c4   :  { %1370 = vmatprep.mubr.f32.mxu0 %v3193_v16  ;;  %v3225_v16 = vld [vmem:[#allocation42_spill] sm:$0xff] }
 0x3c7   :  { %1371 = vmatmul.mubr.f32.gmra.mxu0 %v3194_v56  ;;  %v3226_v56 = vld [vmem:[#allocation41_spill] sm:$0xff] }
 0x3c8   :  { %1375 = vmatprep.mubr.f32.mxu0 %v3195_v37  ;;  %v3227_v37 = vld [vmem:[#allocation40_spill] sm:$0xff] }
 0x3cb   :  { %1376 = vmatmul.mubr.f32.gmra.mxu0 %v3196_v11  ;;  %v3228_v11 = vld [vmem:[#allocation39_spill] sm:$0xff] }
 0x3cc   :  { %1380 = vmatprep.mubr.f32.mxu0 %v3197_v39  ;;  %v3229_v39 = vld [vmem:[#allocation38_spill] sm:$0xff] }
 0x3cf   :  { %1381 = vmatmul.mubr.f32.gmra.mxu0 %v3198_v55  ;;  %v3230_v55 = vld [vmem:[#allocation37_spill] sm:$0xff] }
 0x3d0   :  { %1385 = vmatprep.mubr.f32.mxu0 %v3199_v46 }
 0x3d3   :  { %1386 = vmatmul.mubr.f32.gmra.mxu0 %v3200_v47  ;;  %v2857_v47 = vld [vmem:[%s2934_s5] ss:$0 sm:$0xff]  ;;  %s2033_s5 = smov [#allocation10]  }
 0x3d4   :  { %1390 = vmatprep.mubr.f32.mxu0 %v3201_v50  ;;  %s1574_s18 = sshll.u32 %s2033_s5, 4  ;;  %s1575_s18 = int_to_ptr.vmem [resolvable:$true] %s1574_s18 }
 0x3d5   :  { %s1998_s19 = scalar_lea.vmem %s1575_s18, 4096  ;;  %p2003_p7 = scmp.lt.s32.totalorder %s1575_s18, %s1575_s18 }
 0x3d6   :  { %p1999_p6 = scmp.ne.s32.totalorder %s1575_s18, %s1998_s19  ;;  %p2004_p8 = scmp.lt.s32.totalorder %s1998_s19, %s1998_s19 }
 0x3d7   :  { %1391 = vmatmul.mubr.f32.gmra.mxu0 %v3202_v12 }
 0x3d8   :  { %1395 = vmatprep.mubr.f32.mxu0 %v3203_v36  ;;  %p2005_p9 = por %p2004_p8, %p2003_p7 }
 0x3da   :  { %p2006_p10 = pnand %p2005_p9, %p1999_p6 }
 0x3db   :  { %1396 = vmatmul.mubr.f32.gmra.mxu0 %v3204_v25 }
 0x3dc   :  { %1400 = vmatprep.mubr.f32.mxu0 %v3205_v43 }
 0x3df   :  { %1401 = vmatmul.mubr.f32.gmra.mxu0 %v3206_v63 }
 0x3e0   :  { %1405 = vmatprep.mubr.f32.mxu0 %v3207_v8 }
 0x3e3   :  { %1406 = vmatmul.mubr.f32.gmra.mxu0 %v3208_v31 }
 0x3e4   :  { %1410 = vmatprep.mubr.f32.mxu0 %v3209_v40 }
 0x3e7   :  { %1411 = vmatmul.mubr.f32.gmra.mxu0 %v3210_v4 }
 0x3e8   :  { %1415 = vmatprep.mubr.f32.mxu0 %v3211_v24 }
 0x3eb   :  { %1416 = vmatmul.mubr.f32.gmra.mxu0 %v3212_v21 }
 0x3ec   :  { %1420 = vmatprep.mubr.f32.mxu0 %v3213_v20 }
 0x3ef   :  { %1421 = vmatmul.mubr.f32.gmra.mxu0 %v3214_v7 }
 0x3f0   :  { %1425 = vmatprep.mubr.f32.mxu0 %v3215_v6 }
 0x3f3   :  { %1426 = vmatmul.mubr.f32.gmra.mxu0 %v3216_v3 }
 0x3f4   :  { %1430 = vmatprep.mubr.f32.mxu0 %v3217_v2 }
 0x3f7   :  { %1431 = vmatmul.mubr.f32.gmra.mxu0 %v3218_v61 }
 0x3f8   :  { %1435 = vmatprep.mubr.f32.mxu0 %v3219_v60 }
 0x3fb   :  { %1436 = vmatmul.mubr.f32.gmra.mxu0 %v3220_v57 }
 0x3fc   :  { %1440 = vmatprep.mubr.f32.mxu0 %v3221_v51 }
 0x3ff   :  { %1441 = vmatmul.mubr.f32.gmra.mxu0 %v3222_v30 }
 0x400   :  { %1445 = vmatprep.mubr.f32.mxu0 %v3223_v41 }
 0x403   :  { %1446 = vmatmul.mubr.f32.gmra.mxu0 %v3224_v5 }
 0x404   :  { %1450 = vmatprep.mubr.f32.mxu0 %v3225_v16 }
 0x407   :  { %1451 = vmatmul.mubr.f32.gmra.mxu0 %v3226_v56 }
 0x408   :  { %1455 = vmatprep.mubr.f32.mxu0 %v3227_v37 }
 0x40b   :  { %1456 = vmatmul.mubr.f32.gmra.mxu0 %v3228_v11 }
 0x40c   :  { %1460 = vmatprep.mubr.f32.mxu0 %v3229_v39 }
 0x40f   :  { %1461 = vmatmul.mubr.f32.gmra.mxu0 %v3230_v55 }
 0x453   :  { %v1307_v46 = vpop.f32.mrf.mxu0 }
 0x454   :  { %v1466_v50 = vmul.f32 %v1307_v46, %v2476_v26 }
 0x455   :  { %v1309_v12 = vpop.f32.mrf.mxu0 }
 0x456   :  { %v1505_v36 = vadd.f32 %v2857_v47, %v1466_v50 }
 0x457   :  { %v1312_v25 = vpop.f32.mrf.mxu0 }
 0x458   :  { %1537 = vst [vmem:[#allocation10] sm:$0xff] %v1505_v36  ;;  %v1467_v43 = vmul.f32 %v1312_v25, %v2466_v45 }
 0x459   :  { %v1314_v63 = vpop.f32.mrf.mxu0 }
 0x45a   :  { %v1506_v8 = vadd.f32 %v2857_v47, %v1467_v43 }
 0x45b   :  { %v1317_v31 = vpop.f32.mrf.mxu0 }
 0x45c   :  { %1538 = vst [vmem:[#allocation10 + $0x8] sm:$0xff] %v1506_v8  ;;  %v1468_v40 = vmul.f32 %v1317_v31, %v2457_v58 }
 0x45d   :  { %v1319_v4 = vpop.f32.mrf.mxu0 }
 0x45e   :  { %v1507_v24 = vadd.f32 %v2857_v47, %v1468_v40 }
 0x45f   :  { %v1322_v21 = vpop.f32.mrf.mxu0 }
 0x460   :  { %1539 = vst [vmem:[#allocation10 + $0x10] sm:$0xff] %v1507_v24  ;;  %v1469_v26 = vmul.f32 %v1322_v21, %v2446_v13 }
 0x461   :  { %v1324_v20 = vpop.f32.mrf.mxu0 }
 0x462   :  { %v1508_v7 = vadd.f32 %v2857_v47, %v1469_v26 }
 0x463   :  { %v1327_v6 = vpop.f32.mrf.mxu0 }
 0x464   :  { %1540 = vst [vmem:[#allocation10 + $0x18] sm:$0xff] %v1508_v7  ;;  %v1470_v45 = vmul.f32 %v1327_v6, %v2434_v14 }
 0x465   :  { %v1329_v3 = vpop.f32.mrf.mxu0 }
 0x466   :  { %v1509_v2 = vadd.f32 %v2857_v47, %v1470_v45 }
 0x467   :  { %v1332_v61 = vpop.f32.mrf.mxu0 }
 0x468   :  { %1541 = vst [vmem:[#allocation10 + $0x20] sm:$0xff] %v1509_v2  ;;  %v1471_v58 = vmul.f32 %v1332_v61, %v3165_v62 }
 0x469   :  { %v1334_v60 = vpop.f32.mrf.mxu0 }
 0x46a   :  { %v1510_v57 = vadd.f32 %v2857_v47, %v1471_v58 }
 0x46b   :  { %v1337_v51 = vpop.f32.mrf.mxu0 }
 0x46c   :  { %1542 = vst [vmem:[#allocation10 + $0x28] sm:$0xff] %v1510_v57  ;;  %v1472_v13 = vmul.f32 %v1337_v51, %v3166_v32 }
 0x46d   :  { %v1339_v30 = vpop.f32.mrf.mxu0 }
 0x46e   :  { %v1511_v41 = vadd.f32 %v2857_v47, %v1472_v13 }
 0x46f   :  { %v1342_v5 = vpop.f32.mrf.mxu0 }
 0x470   :  { %1543 = vst [vmem:[#allocation10 + $0x30] sm:$0xff] %v1511_v41  ;;  %v1473_v14 = vmul.f32 %v1342_v5, %v3167_v15 }
 0x471   :  { %v1344_v16 = vpop.f32.mrf.mxu0 }
 0x472   :  { %v1512_v56 = vadd.f32 %v2857_v47, %v1473_v14 }
 0x473   :  { %v1347_v37 = vpop.f32.mrf.mxu0 }
 0x474   :  { %1544 = vst [vmem:[#allocation10 + $0x38] sm:$0xff] %v1512_v56  ;;  %v1474_v62 = vmul.f32 %v1347_v37, %v3168_v38 }
 0x475   :  { %v1349_v11 = vpop.f32.mrf.mxu0 }
 0x476   :  { %v1513_v39 = vadd.f32 %v2857_v47, %v1474_v62 }
 0x477   :  { %v1352_v55 = vpop.f32.mrf.mxu0 }
 0x478   :  { %1545 = vst [vmem:[#allocation10 + $0x40] sm:$0xff] %v1513_v39  ;;  %v1475_v32 = vmul.f32 %v1352_v55, %v3169_v22 }
 0x479   :  { %v1354_v46 = vpop.f32.mrf.mxu0 }
 0x47a   :  { %v1514_v50 = vadd.f32 %v2857_v47, %v1475_v32 }
 0x47b   :  { %v1357_v12 = vpop.f32.mrf.mxu0 }
 0x47c   :  { %1546 = vst [vmem:[#allocation10 + $0x48] sm:$0xff] %v1514_v50  ;;  %v1476_v15 = vmul.f32 %v1357_v12, %v3170_v19 }
 0x47d   :  { %v1359_v36 = vpop.f32.mrf.mxu0 }
 0x47e   :  { %v1515_v25 = vadd.f32 %v2857_v47, %v1476_v15 }
 0x47f   :  { %v1362_v43 = vpop.f32.mrf.mxu0 }
 0x480   :  { %1547 = vst [vmem:[#allocation10 + $0x50] sm:$0xff] %v1515_v25  ;;  %v1477_v38 = vmul.f32 %v1362_v43, %v3171_v54 }
 0x481   :  { %v1364_v63 = vpop.f32.mrf.mxu0 }
 0x482   :  { %v1516_v8 = vadd.f32 %v2857_v47, %v1477_v38 }
 0x483   :  { %v1367_v31 = vpop.f32.mrf.mxu0 }
 0x484   :  { %1548 = vst [vmem:[#allocation10 + $0x58] sm:$0xff] %v1516_v8  ;;  %v1478_v22 = vmul.f32 %v1367_v31, %v3172_v28 }
 0x485   :  { %v1369_v40 = vpop.f32.mrf.mxu0 }
 0x486   :  { %v1517_v4 = vadd.f32 %v2857_v47, %v1478_v22 }
 0x487   :  { %v1372_v24 = vpop.f32.mrf.mxu0 }
 0x488   :  { %1549 = vst [vmem:[#allocation10 + $0x60] sm:$0xff] %v1517_v4  ;;  %v1479_v19 = vmul.f32 %v1372_v24, %v3173_v48 }
 0x489   :  { %v1374_v21 = vpop.f32.mrf.mxu0 }
 0x48a   :  { %v1518_v26 = vadd.f32 %v2857_v47, %v1479_v19 }
 0x48b   :  { %v1377_v20 = vpop.f32.mrf.mxu0 }
 0x48c   :  { %1550 = vst [vmem:[#allocation10 + $0x68] sm:$0xff] %v1518_v26  ;;  %v1480_v54 = vmul.f32 %v1377_v20, %v3174_v33 }
 0x48d   :  { %v1379_v7 = vpop.f32.mrf.mxu0 }
 0x48e   :  { %v1519_v6 = vadd.f32 %v2857_v47, %v1480_v54 }
 0x48f   :  { %v1382_v45 = vpop.f32.mrf.mxu0 }
 0x490   :  { %1551 = vst [vmem:[#allocation10 + $0x70] sm:$0xff] %v1519_v6  ;;  %v1481_v28 = vmul.f32 %v1382_v45, %v3175_v27 }
 0x491   :  { %v1384_v3 = vpop.f32.mrf.mxu0 }
 0x492   :  { %v1520_v2 = vadd.f32 %v2857_v47, %v1481_v28 }
 0x493   :  { %v1387_v61 = vpop.f32.mrf.mxu0 }
 0x494   :  { %1552 = vst [vmem:[#allocation10 + $0x78] sm:$0xff] %v1520_v2  ;;  %v1482_v48 = vmul.f32 %v1387_v61, %v2579_v49 }
 0x495   :  { %v1389_v58 = vpop.f32.mrf.mxu0 }
 0x496   :  { %v1521_v60 = vadd.f32 %v2857_v47, %v1482_v48 }
 0x497   :  { %v1392_v57 = vpop.f32.mrf.mxu0 }
 0x498   :  { %1553 = vst [vmem:[#allocation10 + $0x80] sm:$0xff] %v1521_v60  ;;  %v1483_v33 = vmul.f32 %v1392_v57, %v2574_v53 }
 0x499   :  { %v1394_v51 = vpop.f32.mrf.mxu0 }
 0x49a   :  { %v1522_v13 = vadd.f32 %v2857_v47, %v1483_v33 }
 0x49b   :  { %v1397_v30 = vpop.f32.mrf.mxu0 }
 0x49c   :  { %1554 = vst [vmem:[#allocation10 + $0x88] sm:$0xff] %v1522_v13  ;;  %v1484_v27 = vmul.f32 %v1397_v30, %v2569_v9 }
 0x49d   :  { %v1399_v41 = vpop.f32.mrf.mxu0 }
 0x49e   :  { %v1523_v5 = vadd.f32 %v2857_v47, %v1484_v27 }
 0x49f   :  { %v1402_v14 = vpop.f32.mrf.mxu0 }
 0x4a0   :  { %1555 = vst [vmem:[#allocation10 + $0x90] sm:$0xff] %v1523_v5  ;;  %v1485_v49 = vmul.f32 %v1402_v14, %v2564_v29 }
 0x4a1   :  { %v1404_v16 = vpop.f32.mrf.mxu0 }
 0x4a2   :  { %v1524_v56 = vadd.f32 %v2857_v47, %v1485_v49 }
 0x4a3   :  { %v1407_v37 = vpop.f32.mrf.mxu0 }
 0x4a4   :  { %1556 = vst [vmem:[#allocation10 + $0x98] sm:$0xff] %v1524_v56  ;;  %v1486_v53 = vmul.f32 %v1407_v37, %v2558_v1 }
 0x4a5   :  { %v1409_v62 = vpop.f32.mrf.mxu0 }
 0x4a6   :  { %v1525_v11 = vadd.f32 %v2857_v47, %v1486_v53 }
 0x4a7   :  { %v1412_v39 = vpop.f32.mrf.mxu0 }
 0x4a8   :  { %1557 = vst [vmem:[#allocation10 + $0xa0] sm:$0xff] %v1525_v11  ;;  %v1487_v9 = vmul.f32 %v1412_v39, %v2552_v42 }
 0x4a9   :  { %v1414_v55 = vpop.f32.mrf.mxu0 }
 0x4aa   :  { %v1526_v32 = vadd.f32 %v2857_v47, %v1487_v9 }
 0x4ab   :  { %v1417_v46 = vpop.f32.mrf.mxu0 }
 0x4ac   :  { %1558 = vst [vmem:[#allocation10 + $0xa8] sm:$0xff] %v1526_v32  ;;  %v1488_v29 = vmul.f32 %v1417_v46, %v2546_v34 }
 0x4ad   :  { %v1419_v50 = vpop.f32.mrf.mxu0 }
 0x4ae   :  { %v1527_v12 = vadd.f32 %v2857_v47, %v1488_v29 }
 0x4af   :  { %v1422_v15 = vpop.f32.mrf.mxu0 }
 0x4b0   :  { %1559 = vst [vmem:[#allocation10 + $0xb0] sm:$0xff] %v1527_v12  ;;  %v1489_v1 = vmul.f32 %v1422_v15, %v2540_v17 }
 0x4b1   :  { %v1424_v36 = vpop.f32.mrf.mxu0 }
 0x4b2   :  { %v1528_v25 = vadd.f32 %v2857_v47, %v1489_v1 }
 0x4b3   :  { %v1427_v43 = vpop.f32.mrf.mxu0 }
 0x4b4   :  { %1560 = vst [vmem:[#allocation10 + $0xb8] sm:$0xff] %v1528_v25  ;;  %v1490_v42 = vmul.f32 %v1427_v43, %v2534_v35 }
 0x4b5   :  { %v1429_v38 = vpop.f32.mrf.mxu0 }
 0x4b6   :  { %v1529_v63 = vadd.f32 %v2857_v47, %v1490_v42 }
 0x4b7   :  { %v1432_v8 = vpop.f32.mrf.mxu0 }
 0x4b8   :  { %1561 = vst [vmem:[#allocation10 + $0xc0] sm:$0xff] %v1529_v63  ;;  %v1491_v34 = vmul.f32 %v1432_v8, %v2528_v23 }
 0x4b9   :  { %v1434_v31 = vpop.f32.mrf.mxu0 }
 0x4ba   :  { %v1530_v22 = vadd.f32 %v2857_v47, %v1491_v34 }
 0x4bb   :  { %v1437_v40 = vpop.f32.mrf.mxu0 }
 0x4bc   :  { %1562 = vst [vmem:[#allocation10 + $0xc8] sm:$0xff] %v1530_v22  ;;  %v1492_v17 = vmul.f32 %v1437_v40, %v2521_v59 }
 0x4bd   :  { %v1439_v4 = vpop.f32.mrf.mxu0 }
 0x4be   :  { %v1531_v24 = vadd.f32 %v2857_v47, %v1492_v17 }
 0x4bf   :  { %v1442_v19 = vpop.f32.mrf.mxu0 }
 0x4c0   :  { %1563 = vst [vmem:[#allocation10 + $0xd0] sm:$0xff] %v1531_v24  ;;  %v1493_v35 = vmul.f32 %v1442_v19, %v2515_v52 }
 0x4c1   :  { %v1444_v21 = vpop.f32.mrf.mxu0 }
 0x4c2   :  { %v1532_v26 = vadd.f32 %v2857_v47, %v1493_v35 }
 0x4c3   :  { %v1447_v20 = vpop.f32.mrf.mxu0 }
 0x4c4   :  { %1564 = vst [vmem:[#allocation10 + $0xd8] sm:$0xff] %v1532_v26  ;;  %v1494_v23 = vmul.f32 %v1447_v20, %v2513_v10 }
 0x4c5   :  { %v1449_v54 = vpop.f32.mrf.mxu0 }
 0x4c6   :  { %v1533_v7 = vadd.f32 %v2857_v47, %v1494_v23 }
 0x4c7   :  { %v1452_v6 = vpop.f32.mrf.mxu0 }
 0x4c8   :  { %1565 = vst [vmem:[#allocation10 + $0xe0] sm:$0xff] %v1533_v7  ;;  %v1495_v59 = vmul.f32 %v1452_v6, %v2507_v0 }
 0x4c9   :  { %v1454_v45 = vpop.f32.mrf.mxu0 }
 0x4ca   :  { %v1534_v28 = vadd.f32 %v2857_v47, %v1495_v59 }
 0x4cb   :  { %v1457_v3 = vpop.f32.mrf.mxu0 }
 0x4cc   :  { %1566 = vst [vmem:[#allocation10 + $0xe8] sm:$0xff] %v1534_v28  ;;  %v1496_v52 = vmul.f32 %v1457_v3, %v2498_v18 }
 0x4cd   :  { %v1459_v2 = vpop.f32.mrf.mxu0 }
 0x4ce   :  { %v1535_v61 = vadd.f32 %v2857_v47, %v1496_v52 }
 0x4cf   :  { %v1462_v48 = vpop.f32.mrf.mxu0 }
 0x4d0   :  { %1567 = vst [vmem:[#allocation10 + $0xf0] sm:$0xff] %v1535_v61  ;;  %v1497_v10 = vmul.f32 %v1462_v48, %v3176_v44 }
 0x4d1   :  { %v1464_v58 = vpop.f32.mrf.mxu0 }
 0x4d2   :  { %v1536_v60 = vadd.f32 %v2857_v47, %v1497_v10 }
 0x4d4   :  { %1568 = vst [vmem:[#allocation10 + $0xf8] sm:$0xff] %v1536_v60 }
 0x4d5   :  { %2009 = shalt.err (!%p2006_p10)
}
 0x4d6   :  { %1580 = dma.vmem_to_hbm [thread:$0]  %s1575_s18, 4096, %s2935_s6, [#allocation4], %s2028_s26, %s2028_s26, %s2029_s27  }
 0x4d7   :  { %2024 = dma.done.wait [#allocation4], 4096  }
 0x4d8   :  { %2025 = vsyncadd [#allocation4], 4294963200 }
 0x4d9   :  { %1584 = vsyncpa [#allocation3], 1 }
 0x4da   :  { %1585 = vsyncpa [#allocation6], 1 }
 0x4db   :  { %1586 = vsyncpa [#allocation9], 1 }
 0x4dc   :  { %1587 = vsyncpa [#allocation4], 1 }

</bundles_post_ra>
